<compile_context>
chip_gen: v7x
topology: tpu7x:2x2x1
jax: 0.10.0
libtpu: 0.0.40
codegen_flags: <defaults>
</compile_context>

<pallas_src>
import jax
import jax.numpy as jnp
from jax import lax
from jax.experimental import pallas as pl
from jax.experimental.pallas import tpu as pltpu


# --------------------------------------------------------------------------
# Kernel factory
# --------------------------------------------------------------------------
def _make_kernel(fout_axis: int, use_xn_cache: bool, approx_reciprocal: bool):
    def _normalize(x_ref):
        # Norm math in f32 for stability; matmul operands stay in input dtype.
        xf = x_ref[...].astype(jnp.float32)                    # [tb, F_in]
        ssq = jnp.sum(xf * xf, axis=1, keepdims=True)          # [tb, 1]
        denom = jnp.sqrt(ssq) + 1e-8
        if approx_reciprocal:
            inv = pl.reciprocal(denom, approx=True)            # EUP slot (~free)
        else:
            inv = 1.0 / denom
        return (xf * inv).astype(x_ref.dtype)

    def _linear_relu(xn, w_ref, b_ref, o_ref):
        # y = xn @ W^T : contract dim 1 of both operands (W stays [tile_n, F_in]).
        y = lax.dot_general(
            xn, w_ref[...],
            dimension_numbers=(((1,), (1,)), ((), ())),
            preferred_element_type=jnp.float32)                # [tb, tile_n] f32
        y = y + b_ref[...].astype(jnp.float32)                 # broadcast [1, tile_n]
        o_ref[...] = jnp.maximum(y, 0.0).astype(o_ref.dtype)   # ReLU + cast (VALU filler)
        # TODO(synk): dropout only applies in training mode; eval forward has none.

    if use_xn_cache:
        def kernel(x_ref, w_ref, b_ref, o_ref, xn_ref):
            @pl.when(pl.program_id(fout_axis) == 0)
            def _():
                xn_ref[...] = _normalize(x_ref)
            _linear_relu(xn_ref[...], w_ref, b_ref, o_ref)
    else:
        def kernel(x_ref, w_ref, b_ref, o_ref):
            _linear_relu(_normalize(x_ref), w_ref, b_ref, o_ref)

    return kernel


# --------------------------------------------------------------------------
# Tile-selection helpers
# --------------------------------------------------------------------------
def _vmem_capacity_bytes():
    try:
        info = pltpu.get_tpu_info()
        cap = getattr(info, "vmem_capacity_bytes", None)
        if cap:
            return int(cap)
    except Exception:
        pass
    return 64 * 1024 * 1024  # conservative: v7x per-TensorCore VMEM


def _pick_tile(total, max_tile, preferred=(256, 128, 8)):
    """Largest divisor of `total` that is <= max_tile, preferring multiples of
    `preferred` (256 first: MXU-friendly on v6e/v7x, still fine on v5e)."""
    if total <= max_tile:
        return total
    divs = [d for d in range(1, int(max_tile) + 1) if total % d == 0]
    for m in preferred:
        cands = [d for d in divs if d % m == 0]
        if cands:
            return max(cands)
    return max(divs)  # always contains 1


# --------------------------------------------------------------------------
# Wrapper
# --------------------------------------------------------------------------
def ff_layer_forward(x, weight, bias=None, *, tile_b=None, tile_n=None,
                     approx_reciprocal=True):
    """Eval-mode FFLayer.forward.

    x:      [B, F_in]
    weight: [F_out, F_in]   (torch nn.Linear layout, NOT transposed)
    bias:   [F_out] or None
    returns [B, F_out]
    """
    B, F_in = x.shape
    F_out, F_in_w = weight.shape
    assert F_in_w == F_in

    if bias is None:
        bias = jnp.zeros((F_out,), weight.dtype)
    bias2d = bias.reshape(1, F_out)

    x_isz = jnp.dtype(x.dtype).itemsize
    w_isz = jnp.dtype(weight.dtype).itemsize
    o_isz = x_isz

    vmem_cap = _vmem_capacity_bytes()

    # --- tile_n: full F_out if the (double-buffered) weight slice fits a ~40%
    # VMEM budget, else budget-derived multiple of 256 (fallback 128). ---------
    if tile_n is None:
        w_budget = int(0.40 * vmem_cap)
        max_tile_n = max(w_budget // max(2 * F_in * w_isz, 1), 128)
        tile_n = _pick_tile(F_out, max_tile_n, preferred=(256, 128))
        if tile_n % 128 != 0 and tile_n != F_out:
            tile_n = F_out  # keep the output last dim lane-dense or full
    assert F_out % tile_n == 0, "F_out must be divisible by tile_n"

    # --- tile_b: as large as the remaining budget allows (f32 temps counted),
    # never shrunk just to create extra grid steps. ---------------------------
    if tile_b is None:
        x_budget = int(0.40 * vmem_cap)
        per_row = (2 * F_in * x_isz          # x double-buffer
                   + 4 * F_in                # xf f32 temp
                   + 4 * tile_n              # f32 dot result row
                   + 2 * tile_n * o_isz      # out double-buffer
                   + F_in * x_isz)           # possible xn VMEM cache
        max_tile_b = max(x_budget // max(per_row, 1), 8)
        tile_b = _pick_tile(B, max_tile_b, preferred=(256, 128, 8))
        if tile_b % 8 != 0 and tile_b != B:
            tile_b = B
    assert B % tile_b == 0, "B must be divisible by tile_b"
    # TODO(synk): ragged batches (B % tile_b != 0) need padding + a row mask.

    n_b = B // tile_b
    n_n = F_out // tile_n

    # --- grid iteration order: minimize HBM re-reads of the bigger operand. ---
    weight_bytes = F_in * F_out * w_isz
    x_bytes = B * F_in * x_isz
    weight_outer = weight_bytes * (n_b - 1) >= x_bytes * (n_n - 1)
    use_xn_cache = (not weight_outer) and (n_n > 1)

    if weight_outer:
        # grid = (F_out tiles, batch tiles): each weight slice DMA'd once.
        grid = (n_n, n_b)
        x_map = lambda j, i: (i, 0)
        w_map = lambda j, i: (j, 0)
        b_map = lambda j, i: (0, j)
        o_map = lambda j, i: (i, j)
        fout_axis = 0
        dims_sem = ("parallel", "parallel")
    else:
        # grid = (batch tiles, F_out tiles): x fetched once; xn cached across j.
        grid = (n_b, n_n)
        x_map = lambda i, j: (i, 0)
        w_map = lambda i, j: (j, 0)
        b_map = lambda i, j: (0, j)
        o_map = lambda i, j: (i, j)
        fout_axis = 1
        # the xn cache creates a dependence along the F_out axis -> "arbitrary"
        dims_sem = ("parallel", "arbitrary") if use_xn_cache else ("parallel", "parallel")

    scratch_shapes = []
    if use_xn_cache:
        scratch_shapes.append(pltpu.VMEM((tile_b, F_in), x.dtype))

    # --- VMEM accounting (double-buffered tiles + f32 temporaries) ------------
    footprint = (2 * tile_b * F_in * x_isz           # x
                 + 2 * tile_n * F_in * w_isz         # weight
                 + 2 * 8 * tile_n * w_isz            # bias (sublane-padded)
                 + 2 * tile_b * tile_n * o_isz       # output
                 + tile_b * F_in * 4                 # xf f32
                 + tile_b * tile_n * 4               # f32 dot result
                 + (tile_b * F_in * x_isz if use_xn_cache else 0))
    vmem_limit = int(min(0.9 * vmem_cap, max(32 * 1024 * 1024, 1.5 * footprint)))

    x_reads = n_n if weight_outer else 1
    w_reads = 1 if weight_outer else n_b
    cost = pl.CostEstimate(
        flops=2 * B * F_in * F_out + 5 * B * F_in,
        transcendentals=2 * B,                        # sqrt + reciprocal per row
        bytes_accessed=(x_reads * x_bytes + w_reads * weight_bytes
                        + F_out * w_isz + B * F_out * o_isz),
    )

    kernel = _make_kernel(fout_axis, use_xn_cache, approx_reciprocal)

    return pl.pallas_call(
        kernel,
        out_shape=jax.ShapeDtypeStruct((B, F_out), x.dtype),
        grid_spec=pltpu.PrefetchScalarGridSpec(
            num_scalar_prefetch=0,
            grid=grid,
            in_specs=[
                pl.BlockSpec((tile_b, F_in), x_map),    # x rows (full F_in: norm needs the whole row)
                pl.BlockSpec((tile_n, F_in), w_map),    # weight slice, torch layout
                pl.BlockSpec((1, tile_n), b_map),       # bias slice
            ],
            out_specs=pl.BlockSpec((tile_b, tile_n), o_map),
            scratch_shapes=scratch_shapes,
        ),
        compiler_params=pltpu.CompilerParams(
            dimension_semantics=dims_sem,
            vmem_limit_bytes=vmem_limit,
        ),
        cost_estimate=cost,
    )(x, weight, bias2d)


# --------------------------------------------------------------------------
# Reference + demo
# --------------------------------------------------------------------------
def _ref_forward(x, weight, bias):
    xf = x.astype(jnp.float32)
    x_norm = jnp.linalg.norm(xf, axis=1, keepdims=True)
    xn = xf / (x_norm + 1e-8)
    return jnp.maximum(xn @ weight.astype(jnp.float32).T + bias.astype(jnp.float32), 0.0)


if __name__ == "__main__":
    key = jax.random.PRNGKey(0)

    def make_case(k, B, F_in, F_out):
        kx, kw, kb = jax.random.split(k, 3)
        x = jax.random.normal(kx, (B, F_in), dtype=jnp.float32)
        bound = 1.0 / jnp.sqrt(jnp.float32(F_in))
        w = jax.random.uniform(kw, (F_out, F_in), jnp.float32, -bound, bound)
        b = jax.random.uniform(kb, (F_out,), jnp.float32, -bound, bound)
        return x, w, b

    def check(out, ref):
        assert out.shape == ref.shape
        assert jnp.allclose(out, ref, atol=2e-3, rtol=2e-3), \
            float(jnp.max(jnp.abs(out - ref)))

    k1, k2, k3 = jax.random.split(key, 3)

    # Case 1: lane-dense F_out (multiple of 128); everything fits -> 1x1 grid,
    # weight resident in VMEM, norm computed once per batch tile.
    x, w, b = make_case(k1, 256, 128, 256)
    out = jax.block_until_ready(ff_layer_forward(x, w, b))
    check(out, _ref_forward(x, w, b))

    # Case 2: toy shapes below the 128-lane width (checks padded lanes do not
    # leak into the L2-norm reduction; falls onto masked partial stores).
    x, w, b = make_case(k2, 8, 32, 64)
    out = jax.block_until_ready(ff_layer_forward(x, w, b))
    check(out, _ref_forward(x, w, b))

    # Case 3: forced 2x2 grid with activation-dominated traffic -> batch-outer
    # order + VMEM xn cache under pl.when (exercises the multi-tile code path).
    x, w, b = make_case(k3, 512, 512, 256)
    out = jax.block_until_ready(ff_layer_forward(x, w, b, tile_b=256, tile_n=128))
    check(out, _ref_forward(x, w, b))

    print("KERNEL_OK")
</pallas_src>

<mosaic_0001>
module attributes {stable_mosaic.version = 11 : i64} {
  func.func @kernel(%arg0: i32, %arg1: i32, %arg2: memref<256x128xf32, #tpu.memory_space<vmem>>, %arg3: memref<256x128xf32, #tpu.memory_space<vmem>>, %arg4: memref<1x256xf32, #tpu.memory_space<vmem>>, %arg5: memref<256x256xf32, #tpu.memory_space<vmem>>) attributes {dimension_semantics = [#tpu.dimension_semantics<parallel>, #tpu.dimension_semantics<parallel>], iteration_bounds = array<i64: 1, 1>, scalar_prefetch = 0 : i64, scratch_operands = 0 : i64, tpu.core_type = #tpu.core_type<tc>, window_params = [{transform_indices = @transform_0, window_bounds = array<i64: 256, 128>}, {transform_indices = @transform_1, window_bounds = array<i64: 256, 128>}, {transform_indices = @transform_2, window_bounds = array<i64: 1, 256>}, {transform_indices = @transform_3, window_bounds = array<i64: 256, 256>}]} {
    %c0 = arith.constant 0 : index
    %c0_0 = arith.constant 0 : index
    %0 = vector.load %arg2[%c0, %c0_0] : memref<256x128xf32, #tpu.memory_space<vmem>>, vector<256x128xf32>
    %1 = arith.mulf %0, %0 : vector<256x128xf32>
    %cst = arith.constant dense<0.000000e+00> : vector<256xf32>
    %2 = vector.multi_reduction <add>, %1, %cst [1] : vector<256x128xf32> to vector<256xf32>
    %3 = vector.shape_cast %2 : vector<256xf32> to vector<256x1xf32>
    %4 = math.sqrt %3 : vector<256x1xf32>
    %cst_1 = arith.constant 9.99999993E-9 : f32
    %5 = vector.broadcast %cst_1 : f32 to vector<256x1xf32>
    %6 = arith.addf %4, %5 : vector<256x1xf32>
    %7 = tpu.reciprocal %6 {approx = true} : vector<256x1xf32> -> vector<256x1xf32>
    %8 = vector.broadcast %7 : vector<256x1xf32> to vector<256x128xf32>
    %9 = arith.mulf %0, %8 : vector<256x128xf32>
    %c0_2 = arith.constant 0 : index
    %c0_3 = arith.constant 0 : index
    %10 = vector.load %arg3[%c0_2, %c0_3] : memref<256x128xf32, #tpu.memory_space<vmem>>, vector<256x128xf32>
    %cst_4 = arith.constant dense<0.000000e+00> : vector<256x256xf32>
    %11 = tpu.matmul %9, %10, %cst_4 {dimension_numbers = #tpu.dot_dimension_numbers<[1], [1], [0], [0], [0, 0, 1, 0], [], []>} : vector<256x128xf32>, vector<256x128xf32>, vector<256x256xf32> -> vector<256x256xf32>
    %c0_5 = arith.constant 0 : index
    %c0_6 = arith.constant 0 : index
    %12 = vector.load %arg4[%c0_5, %c0_6] : memref<1x256xf32, #tpu.memory_space<vmem>>, vector<1x256xf32>
    %13 = vector.broadcast %12 : vector<1x256xf32> to vector<256x256xf32>
    %14 = arith.addf %11, %13 : vector<256x256xf32>
    %cst_7 = arith.constant 0.000000e+00 : f32
    %15 = vector.broadcast %cst_7 : f32 to vector<256x256xf32>
    %16 = arith.maximumf %14, %15 : vector<256x256xf32>
    %c0_8 = arith.constant 0 : index
    %c0_9 = arith.constant 0 : index
    %17 = vector.load %arg5[%c0_8, %c0_9] : memref<256x256xf32, #tpu.memory_space<vmem>>, vector<256x256xf32>
    tpu.vector_store %arg5[%c0_8, %c0_9], %16 {strides = array<i32>} : memref<256x256xf32, #tpu.memory_space<vmem>>, vector<256x256xf32>,
    return
  }
  func.func @transform_0(%arg0: i32, %arg1: i32) -> (i32, i32) {
    %c0_i32 = arith.constant 0 : i32
    %c0_i32_0 = arith.constant 0 : i32
    return %arg1, %c0_i32 : i32, i32
  }
  func.func @transform_1(%arg0: i32, %arg1: i32) -> (i32, i32) {
    %c0_i32 = arith.constant 0 : i32
    %c0_i32_0 = arith.constant 0 : i32
    return %arg0, %c0_i32 : i32, i32
  }
  func.func @transform_2(%arg0: i32, %arg1: i32) -> (i32, i32) {
    %c0_i32 = arith.constant 0 : i32
    %c0_i32_0 = arith.constant 0 : i32
    return %c0_i32, %arg0 : i32, i32
  }
  func.func @transform_3(%arg0: i32, %arg1: i32) -> (i32, i32) {
    %c0_i32 = arith.constant 0 : i32
    return %arg1, %arg0 : i32, i32
  }
}

</mosaic_0001>

<bundles_post_ra>
// kernel: tpu_custom_call.1
= control target key start
LH: loop header
LB: loop body
LE: loop exit
PB: predicated region body
PF: predicated region fallthrough
CT: control target
= control target key end

     0   :  { %8 = vsyncpa [#allocation3], 0  ;;  %s1914_s0 = inlined_call_operand.hbm [shape: f32[256,128], index: 0, kind: input, shape index: {}]   ;;  %s1915_s1 = inlined_call_operand.hbm [shape: f32[256,128], index: 1, kind: input, shape index: {}]   ;;  %s1916_s2 = inlined_call_operand.vmem [shape: f32[1,256], index: 2, kind: input, shape index: {}]   ;;  %s1917_s3 = inlined_call_operand.hbm [shape: f32[256,256], index: 3, kind: output, shape index: {}]  }
   0x1   :  { %9 = vsyncpa [#allocation6], 0 }
   0x2   :  { %10 = vsyncpa [#allocation4], 0  ;;  %s1294_s12 = smov [#allocation2]   ;;  %s1222_s16 = scalar_lea.hbm %s1914_s0, 4096 }
   0x3   :  { %s16_s13 = sshll.u32 %s1294_s12, 4  ;;  %p1223_p0 = scmp.ne.s32.totalorder %s1914_s0, %s1222_s16  ;;  %s17_s13 = int_to_ptr.vmem [resolvable:$true] %s16_s13 }
   0x4   :  { %p1226_p1 = scmp.lt.u32.totalorder %s1222_s16, %s1914_s0 }
   0x6   :  { %p1228_p2 = pnand %p1226_p1, %p1223_p0 }
   0x8   :  { %1231 = shalt.err (!%p1228_p2)
}
   0x9   :  { %s1232_s21 = scalar_lea.vmem %s17_s13, 4096  ;;  %p1237_p4 = scmp.lt.s32.totalorder %s17_s13, %s17_s13 }
   0xa   :  { %p1233_p3 = scmp.ne.s32.totalorder %s17_s13, %s1232_s21  ;;  %p1238_p5 = scmp.lt.s32.totalorder %s1232_s21, %s1232_s21 }
   0xc   :  { %p1239_p6 = por %p1238_p5, %p1237_p4 }
   0xe   :  { %p1240_p7 = pnand %p1239_p6, %p1233_p3 }
  0x10   :  { %1243 = shalt.err (!%p1240_p7)
}
  0x11   :  { %s1295_s22 = smov 128   ;;  %s1296_s23 = smov 8  }
  0x12   :  { %22 = dma.hbm_to_vmem [thread:$0]  %s1914_s0, 4096, %s17_s13, [#allocation3], %s1295_s22, %s1295_s22, %s1296_s23  }
  0x13   :  { %s1297_s26 = smov [#allocation5]   ;;  %s1244_s30 = scalar_lea.hbm %s1915_s1, 4096 }
  0x14   :  { %s28_s27 = sshll.u32 %s1297_s26, 4  ;;  %p1245_p8 = scmp.ne.s32.totalorder %s1915_s1, %s1244_s30  ;;  %s29_s27 = int_to_ptr.vmem [resolvable:$true] %s28_s27 }
  0x15   :  { %p1248_p9 = scmp.lt.u32.totalorder %s1244_s30, %s1915_s1 }
  0x17   :  { %p1250_p10 = pnand %p1248_p9, %p1245_p8 }
  0x19   :  { %1253 = shalt.err (!%p1250_p10)
}
  0x1a   :  { %s1254_s8 = scalar_lea.vmem %s29_s27, 4096  ;;  %p1259_p12 = scmp.lt.s32.totalorder %s29_s27, %s29_s27 }
  0x1b   :  { %p1255_p11 = scmp.ne.s32.totalorder %s29_s27, %s1254_s8  ;;  %p1260_p13 = scmp.lt.s32.totalorder %s1254_s8, %s1254_s8 }
  0x1d   :  { %p1261_p0 = por %p1260_p13, %p1259_p12 }
  0x1f   :  { %p1262_p1 = pnand %p1261_p0, %p1255_p11 }
  0x21   :  { %1265 = shalt.err (!%p1262_p1)
}
  0x22   :  { %34 = dma.hbm_to_vmem [thread:$0]  %s1915_s1, 4096, %s29_s27, [#allocation6], %s1295_s22, %s1295_s22, %s1296_s23  }
  0x23   :  { %1288 = dma.done.wait [#allocation3], 4096  }
  0x24   :  { %1289 = vsyncadd [#allocation3], 4294963200 }
  0x25   :  { %1290 = dma.done.wait [#allocation6], 4096  }
  0x26   :  { %1291 = vsyncadd [#allocation6], 4294963200  ;;  %v1345_v0 = vld [vmem:[#allocation2 + $0x8] sm:$0xff]  ;;  %v1347_v1 = vld [vmem:[#allocation2] sm:$0xff] }
  0x27   :  { %v1349_v2 = vld [vmem:[#allocation2 + $0x88] sm:$0xff]  ;;  %v76_v3 = vmul.f32 %v1345_v0, %v1345_v0  ;;  %v75_v4 = vmul.f32 %v1347_v1, %v1347_v1  ;;  %v1355_v5 = vld [vmem:[#allocation2 + $0x80] sm:$0xff]  ;;  %v1361_v8 = vld [vmem:[#allocation2 + $0x90] sm:$0xff] }
  0x28   :  { %v92_v6 = vmul.f32 %v1349_v2, %v1349_v2  ;;  %v91_v7 = vmul.f32 %v1355_v5, %v1355_v5  ;;  %v1363_v9 = vld [vmem:[#allocation2 + $0x10] sm:$0xff]  ;;  %v93_v10 = vmul.f32 %v1361_v8, %v1361_v8  ;;  %v1369_v12 = vld [vmem:[#allocation2 + $0x98] sm:$0xff]  ;;  %v1373_v14 = vld [vmem:[#allocation2 + $0xa0] sm:$0xff] }
  0x29   :  { %109 = vadd.xlane.f32.xlu1 %v76_v3  ;;  %107 = vadd.xlane.f32.xlu0 %v75_v4  ;;  %v77_v11 = vmul.f32 %v1363_v9, %v1363_v9  ;;  %v1371_v13 = vld [vmem:[#allocation2 + $0x18] sm:$0xff]  ;;  %v507_v15 = vld [vmem:[#allocation5 + $0x80] sm:$0xff]  ;;  %v94_v16 = vmul.f32 %v1369_v12, %v1369_v12  ;;  %v508_v18 = vld [vmem:[#allocation5 + $0x88] sm:$0xff]  ;;  %v95_v27 = vmul.f32 %v1373_v14, %v1373_v14 }
  0x2a   :  { %v78_v17 = vmul.f32 %v1371_v13, %v1371_v13  ;;  %v491_v19 = vld [vmem:[#allocation5] sm:$0xff]  ;;  %v492_v20 = vld [vmem:[#allocation5 + $0x8] sm:$0xff]  ;;  %v1034_v22 = vpack.c.bf16 %v508_v18, %v507_v15  ;;  %v509_v24 = vld [vmem:[#allocation5 + $0x90] sm:$0xff] }
  0x2b   :  { %v1379_v21 = vld [vmem:[#allocation2 + $0x20] sm:$0xff]  ;;  %v1036_v23 = vpack.c.bf16 %v492_v20, %v491_v19  ;;  %v510_v25 = vld [vmem:[#allocation5 + $0x98] sm:$0xff]  ;;  %v1385_v29 = vld [vmem:[#allocation2 + $0xa8] sm:$0xff] }
  0x2c   :  { %v1038_v26 = vpack.c.bf16 %v510_v25, %v509_v24  ;;  %1035 = vmatprep.subr.bf16.mxu0 %v1034_v22  ;;  %1066 = vmatprep.subr.bf16.mxu1 %v1034_v22  ;;  %v79_v28 = vmul.f32 %v1379_v21, %v1379_v21  ;;  %v1387_v30 = vld [vmem:[#allocation2 + $0x28] sm:$0xff]  ;;  %v493_v31 = vld [vmem:[#allocation5 + $0x10] sm:$0xff]  ;;  %v494_v32 = vld [vmem:[#allocation5 + $0x18] sm:$0xff]  ;;  %v96_v35 = vmul.f32 %v1385_v29, %v1385_v29 }
  0x2d   :  { %141 = vadd.xlane.f32.xlu1 %v92_v6  ;;  %139 = vadd.xlane.f32.xlu0 %v91_v7  ;;  %v511_v33 = vld [vmem:[#allocation5 + $0xa0] sm:$0xff]  ;;  %v512_v34 = vld [vmem:[#allocation5 + $0xa8] sm:$0xff]  ;;  %v80_v36 = vmul.f32 %v1387_v30, %v1387_v30  ;;  %v1393_v37 = vld [vmem:[#allocation2 + $0xb0] sm:$0xff]  ;;  %v1040_v39 = vpack.c.bf16 %v494_v32, %v493_v31 }
  0x2e   :  { %1037 = vmatpush3.bf16.xpose.msra.mxu0 %v1036_v23  ;;  %1074 = vmatpush3.bf16.xpose.msra.mxu1 %v1036_v23  ;;  %v1395_v38 = vld [vmem:[#allocation2 + $0x30] sm:$0xff]  ;;  %v1042_v40 = vpack.c.bf16 %v512_v34, %v511_v33  ;;  %v97_v41 = vmul.f32 %v1393_v37, %v1393_v37  ;;  %v1401_v43 = vld [vmem:[#allocation2 + $0xb8] sm:$0xff]  ;;  %v495_v45 = vld [vmem:[#allocation5 + $0x20] sm:$0xff] }
  0x2f   :  { %1039 = vmatprep.subr.bf16.mxu0 %v1038_v26  ;;  %1067 = vmatprep.subr.bf16.mxu1 %v1038_v26  ;;  %v81_v42 = vmul.f32 %v1395_v38, %v1395_v38  ;;  %v1403_v44 = vld [vmem:[#allocation2 + $0x38] sm:$0xff]  ;;  %v496_v46 = vld [vmem:[#allocation5 + $0x28] sm:$0xff]  ;;  %v513_v47 = vld [vmem:[#allocation5 + $0xb0] sm:$0xff]  ;;  %v98_v49 = vmul.f32 %v1401_v43, %v1401_v43 }
  0x30   :  { %v514_v48 = vld [vmem:[#allocation5 + $0xb8] sm:$0xff]  ;;  %v82_v50 = vmul.f32 %v1403_v44, %v1403_v44  ;;  %v1409_v51 = vld [vmem:[#allocation2 + $0xc0] sm:$0xff]  ;;  %v1044_v53 = vpack.c.bf16 %v496_v46, %v495_v45  ;;  %v68_v57 = vld [vmem:[#allocation2 + $0xc8] sm:$0xff] }
  0x31   :  { %143 = vadd.xlane.f32.xlu1 %v93_v10  ;;  %111 = vadd.xlane.f32.xlu0 %v77_v11  ;;  %v1411_v52 = vld [vmem:[#allocation2 + $0x40] sm:$0xff]  ;;  %v1046_v54 = vpack.c.bf16 %v514_v48, %v513_v47  ;;  %v99_v55 = vmul.f32 %v1409_v51, %v1409_v51  ;;  %v1417_v58 = vld [vmem:[#allocation2 + $0x48] sm:$0xff]  ;;  %v497_v59 = vld [vmem:[#allocation5 + $0x30] sm:$0xff]  ;;  %v100_v63 = vmul.f32 %v68_v57, %v68_v57 }
  0x32   :  { %v83_v56 = vmul.f32 %v1411_v52, %v1411_v52  ;;  %v498_v60 = vld [vmem:[#allocation5 + $0x38] sm:$0xff]  ;;  %v515_v61 = vld [vmem:[#allocation5 + $0xc0] sm:$0xff]  ;;  %v516_v62 = vld [vmem:[#allocation5 + $0xc8] sm:$0xff]  ;;  %v84_v3 = vmul.f32 %v1417_v58, %v1417_v58 }
  0x33   :  { %v69_v4 = vld [vmem:[#allocation2 + $0xd0] sm:$0xff]  ;;  %v1048_v7 = vpack.c.bf16 %v498_v60, %v497_v59  ;;  %v1050_v10 = vpack.c.bf16 %v516_v62, %v515_v61  ;;  %v499_v18 = vld [vmem:[#allocation5 + $0x40] sm:$0xff]  ;;  %v500_v19 = vld [vmem:[#allocation5 + $0x48] sm:$0xff] }
  0x34   :  { %v1421_v6 = vld [vmem:[#allocation2 + $0x50] sm:$0xff]  ;;  %v101_v11 = vmul.f32 %v69_v4, %v69_v4  ;;  %v518_v22 = vld [vmem:[#allocation5 + $0xd8] sm:$0xff]  ;;  %v71_v25 = vld [vmem:[#allocation2 + $0xe0] sm:$0xff] }
  0x35   :  { %145 = vadd.xlane.f32.xlu1 %v94_v16  ;;  %113 = vadd.xlane.f32.xlu0 %v78_v17  ;;  %v85_v15 = vmul.f32 %v1421_v6, %v1421_v6  ;;  %v70_v16 = vld [vmem:[#allocation2 + $0xd8] sm:$0xff]  ;;  %v517_v20 = vld [vmem:[#allocation5 + $0xd0] sm:$0xff]  ;;  %v1429_v26 = vld [vmem:[#allocation2 + $0x60] sm:$0xff]  ;;  %v103_v31 = vmul.f32 %v71_v25, %v71_v25 }
  0x36   :  { %1041 = vmatpush3.bf16.xpose.msra.mxu0 %v1040_v39  ;;  %1075 = vmatpush3.bf16.xpose.msra.mxu1 %v1040_v39  ;;  %v1425_v17 = vld [vmem:[#allocation2 + $0x58] sm:$0xff]  ;;  %v102_v23 = vmul.f32 %v70_v16, %v70_v16  ;;  %v87_v32 = vmul.f32 %v1429_v26, %v1429_v26  ;;  %v72_v33 = vld [vmem:[#allocation2 + $0xe8] sm:$0xff]  ;;  %v519_v39 = vld [vmem:[#allocation5 + $0xe0] sm:$0xff] }
  0x37   :  { %1043 = vmatprep.subr.bf16.mxu0 %v1042_v40  ;;  %1068 = vmatprep.subr.bf16.mxu1 %v1042_v40  ;;  %v86_v24 = vmul.f32 %v1425_v17, %v1425_v17  ;;  %v1433_v34 = vld [vmem:[#allocation2 + $0x68] sm:$0xff]  ;;  %v1437_v45 = vld [vmem:[#allocation2 + $0xf0] sm:$0xff]  ;;  %v522_v59 = vld [vmem:[#allocation5 + $0xf8] sm:$0xff] }
  0x38   :  { %v520_v40 = vld [vmem:[#allocation5 + $0xe8] sm:$0xff]  ;;  %v1439_v46 = vld [vmem:[#allocation2 + $0x70] sm:$0xff]  ;;  %v506_v4 = vld [vmem:[#allocation5 + $0x78] sm:$0xff] }
  0x39   :  { %147 = vadd.xlane.f32.xlu1 %v95_v27  ;;  %115 = vadd.xlane.f32.xlu0 %v79_v28  ;;  %v1052_v27 = vpack.c.bf16 %v500_v19, %v499_v18  ;;  %v1054_v28 = vpack.c.bf16 %v518_v22, %v517_v20  ;;  %v1058_v48 = vpack.c.bf16 %v520_v40, %v519_v39  ;;  %v521_v57 = vld [vmem:[#allocation5 + $0xf0] sm:$0xff] }
  0x3d   :  { %149 = vadd.xlane.f32.xlu1 %v96_v35  ;;  %117 = vadd.xlane.f32.xlu0 %v80_v36  ;;  %v501_v35 = vld [vmem:[#allocation5 + $0x50] sm:$0xff]  ;;  %v502_v36 = vld [vmem:[#allocation5 + $0x58] sm:$0xff] }
  0x3e   :  { %1045 = vmatpush3.bf16.xpose.msra.mxu0 %v1044_v53  ;;  %1076 = vmatpush3.bf16.xpose.msra.mxu1 %v1044_v53  ;;  %v1056_v47 = vpack.c.bf16 %v502_v36, %v501_v35  ;;  %v1445_v53 = vld [vmem:[#allocation2 + $0xf8] sm:$0xff] }
  0x3f   :  { %1047 = vmatprep.subr.bf16.mxu0 %v1046_v54  ;;  %1069 = vmatprep.subr.bf16.mxu1 %v1046_v54  ;;  %v1447_v54 = vld [vmem:[#allocation2 + $0x78] sm:$0xff]  ;;  %v106_v60 = vmul.f32 %v1445_v53, %v1445_v53 }
  0x40   :  { %v90_v61 = vmul.f32 %v1447_v54, %v1447_v54 }
  0x41   :  { %151 = vadd.xlane.f32.xlu1 %v97_v41  ;;  %119 = vadd.xlane.f32.xlu0 %v81_v42  ;;  %v104_v41 = vmul.f32 %v72_v33, %v72_v33  ;;  %v88_v42 = vmul.f32 %v1433_v34, %v1433_v34 }
  0x45   :  { %153 = vadd.xlane.f32.xlu1 %v98_v49  ;;  %121 = vadd.xlane.f32.xlu0 %v82_v50  ;;  %v105_v49 = vmul.f32 %v1437_v45, %v1437_v45  ;;  %v89_v50 = vmul.f32 %v1439_v46, %v1439_v46 }
  0x46   :  { %1049 = vmatpush3.bf16.xpose.msra.mxu0 %v1048_v7  ;;  %1077 = vmatpush3.bf16.xpose.msra.mxu1 %v1048_v7 }
  0x47   :  { %1051 = vmatprep.subr.bf16.mxu0 %v1050_v10  ;;  %1070 = vmatprep.subr.bf16.mxu1 %v1050_v10 }
  0x49   :  { %155 = vadd.xlane.f32.xlu1 %v99_v55  ;;  %123 = vadd.xlane.f32.xlu0 %v83_v56  ;;  %v503_v55 = vld [vmem:[#allocation5 + $0x60] sm:$0xff]  ;;  %v504_v56 = vld [vmem:[#allocation5 + $0x68] sm:$0xff] }
  0x4a   :  { %v1060_v62 = vpack.c.bf16 %v504_v56, %v503_v55 }
  0x4d   :  { %157 = vadd.xlane.f32.xlu1 %v100_v63  ;;  %125 = vadd.xlane.f32.xlu0 %v84_v3  ;;  %v1062_v63 = vpack.c.bf16 %v522_v59, %v521_v57  ;;  %v505_v3 = vld [vmem:[#allocation5 + $0x70] sm:$0xff] }
  0x4e   :  { %1053 = vmatpush3.bf16.xpose.msra.mxu0 %v1052_v27  ;;  %1078 = vmatpush3.bf16.xpose.msra.mxu1 %v1052_v27  ;;  %v1064_v7 = vpack.c.bf16 %v506_v4, %v505_v3 }
  0x4f   :  { %1055 = vmatprep.subr.bf16.mxu0 %v1054_v28  ;;  %1071 = vmatprep.subr.bf16.mxu1 %v1054_v28 }
  0x51   :  { %159 = vadd.xlane.f32.xlu1 %v101_v11  ;;  %127 = vadd.xlane.f32.xlu0 %v85_v15 }
  0x55   :  { %161 = vadd.xlane.f32.xlu1 %v102_v23  ;;  %129 = vadd.xlane.f32.xlu0 %v86_v24 }
  0x56   :  { %1057 = vmatpush3.bf16.xpose.msra.mxu0 %v1056_v47  ;;  %1079 = vmatpush3.bf16.xpose.msra.mxu1 %v1056_v47 }
  0x57   :  { %1059 = vmatprep.subr.bf16.mxu0 %v1058_v48  ;;  %1072 = vmatprep.subr.bf16.mxu1 %v1058_v48 }
  0x59   :  { %163 = vadd.xlane.f32.xlu1 %v103_v31  ;;  %131 = vadd.xlane.f32.xlu0 %v87_v32 }
  0x5d   :  { %165 = vadd.xlane.f32.xlu1 %v104_v41  ;;  %133 = vadd.xlane.f32.xlu0 %v88_v42 }
  0x5e   :  { %1061 = vmatpush3.bf16.xpose.msra.mxu0 %v1060_v62  ;;  %1080 = vmatpush3.bf16.xpose.msra.mxu1 %v1060_v62 }
  0x5f   :  { %1063 = vmatprep.subr.bf16.mxu0 %v1062_v63  ;;  %1073 = vmatprep.subr.bf16.mxu1 %v1062_v63 }
  0x61   :  { %167 = vadd.xlane.f32.xlu1 %v105_v49  ;;  %135 = vadd.xlane.f32.xlu0 %v89_v50 }
  0x65   :  { %169 = vadd.xlane.f32.xlu1 %v106_v60  ;;  %137 = vadd.xlane.f32.xlu0 %v90_v61 }
  0x66   :  { %1065 = vmatpush3.bf16.xpose.msra.mxu0 %v1064_v7  ;;  %1081 = vmatpush3.bf16.xpose.msra.mxu1 %v1064_v7 }
  0xb6   :  { %v110_v10 = vpop.xlane.xlu1 %109  ;;  %v1453_v11 = vpop.xlane.xlu0 %107 }
  0xb7   :  { %1089 = vrsqrt.f32 %v110_v10  ;;  %vm180_vm0 = vcmp.eq.f32.partialorder %v110_v10, inf  ;;  %vm182_vm1 = vcmp.eq.f32.partialorder %v110_v10, 0.0  ;;  %v183_v33 = vand.u32 2147483648, %v110_v10 }
  0xb8   :  { %1091 = vrsqrt.f32 %v1453_v11  ;;  %vm173_vm2 = vcmp.eq.f32.partialorder %v1453_v11, inf  ;;  %vm175_vm3 = vcmp.eq.f32.partialorder %v1453_v11, 0.0  ;;  %v176_v39 = vand.u32 2147483648, %v1453_v11 }
  0xba   :  { %v1455_v15 = vpop.xlane.xlu1 %141  ;;  %v1457_v16 = vpop.xlane.xlu0 %139 }
  0xbb   :  { %1093 = vrsqrt.f32 %v1455_v15  ;;  %vm292_vm4 = vcmp.eq.f32.partialorder %v1455_v15, inf  ;;  %vm294_vm5 = vcmp.eq.f32.partialorder %v1455_v15, 0.0  ;;  %v295_v47 = vand.u32 2147483648, %v1455_v15 }
  0xbc   :  { %v288_v48 = vand.u32 2147483648, %v1457_v16  ;;  %vm285_vm6 = vcmp.eq.f32.partialorder %v1457_v16, inf }
  0xbe   :  { %v1461_v18 = vpop.xlane.xlu1 %143  ;;  %v1463_v19 = vpop.xlane.xlu0 %111 }
  0xbf   :  { %1095 = vrsqrt.f32 %v1461_v18  ;;  %vm299_vm7 = vcmp.eq.f32.partialorder %v1461_v18, inf  ;;  %vm301_vm8 = vcmp.eq.f32.partialorder %v1461_v18, 0.0  ;;  %v302_v55 = vand.u32 2147483648, %v1461_v18 }
  0xc0   :  { %1097 = vrsqrt.f32 %v1463_v19  ;;  %vm187_vm9 = vcmp.eq.f32.partialorder %v1463_v19, inf  ;;  %vm189_vm10 = vcmp.eq.f32.partialorder %v1463_v19, 0.0  ;;  %v190_v63 = vand.u32 2147483648, %v1463_v19 }
  0xc1   :  { %v1090_v20 = vpop.eup %1089  ;;  %1099 = vrsqrt.f32 %v1457_v16 }
  0xc2   :  { %v1468_v22 = vpop.xlane.xlu1 %145  ;;  %v1470_v23 = vpop.xlane.xlu0 %113  ;;  %v179_v24 = vmul.f32 %v1090_v20, %v110_v10 }
  0xc3   :  { %1101 = vrsqrt.f32 %v1468_v22  ;;  %v1092_v25 = vpop.eup %1091  ;;  %vm306_vm11 = vcmp.eq.f32.partialorder %v1468_v22, inf  ;;  %vm308_vm12 = vcmp.eq.f32.partialorder %v1468_v22, 0.0  ;;  %v309_v7 = vand.u32 2147483648, %v1468_v22 }
  0xc4   :  { %1103 = vrsqrt.f32 %v1470_v23  ;;  %v181_v32 = vsel %vm180_vm0, %v110_v10, %v179_v24  ;;  %v172_v35 = vmul.f32 %v1092_v25, %v1453_v11  ;;  %vm194_vm13 = vcmp.eq.f32.partialorder %v1470_v23, inf }
  0xc5   :  { %v1094_v31 = vpop.eup %1093  ;;  %v184_v41 = vsel %vm182_vm1, %v183_v33, %v181_v32  ;;  %vm196_vm14 = vcmp.eq.f32.partialorder %v1470_v23, 0.0  ;;  %v197_v24 = vand.u32 2147483648, %v1470_v23 }
  0xc6   :  { %v1474_v27 = vpop.xlane.xlu1 %147  ;;  %v1476_v28 = vpop.xlane.xlu0 %115  ;;  %v291_v42 = vmul.f32 %v1094_v31, %v1455_v15  ;;  %v174_v57 = vsel %vm173_vm2, %v1453_v11, %v172_v35  ;;  %v396_v61 = vadd.f32 1e-08, %v184_v41 }
  0xc7   :  { %1105 = vrsqrt.f32 %v1474_v27  ;;  %v177_v25 = vsel %vm175_vm3, %v176_v39, %v174_v57  ;;  %vm313_vm15 = vcmp.eq.f32.partialorder %v1474_v27, inf  ;;  %vm315_vm0 = vcmp.eq.f32.partialorder %v1474_v27, 0.0 }
  0xc8   :  { %1107 = vrsqrt.f32 %v1476_v28  ;;  %v293_v4 = vsel %vm292_vm4, %v1455_v15, %v291_v42  ;;  %vm201_vm1 = vcmp.eq.f32.partialorder %v1476_v28, inf  ;;  %vm203_vm2 = vcmp.eq.f32.partialorder %v1476_v28, 0.0 }
  0xc9   :  { %v1096_v36 = vpop.eup %1095  ;;  %vm287_vm3 = vcmp.eq.f32.partialorder %v1457_v16, 0.0 }
  0xca   :  { %v1098_v40 = vpop.eup %1097  ;;  %v1489_v49 = vpop.xlane.xlu1 %149  ;;  %v298_v59 = vmul.f32 %v1096_v36, %v1461_v18  ;;  %v296_v36 = vsel %vm294_vm5, %v295_v47, %v293_v4 }
  0xcb   :  { %v1491_v50 = vpop.xlane.xlu0 %117  ;;  %1109 = vrsqrt.f32 %v1489_v49  ;;  %v1100_v56 = vpop.eup %1099  ;;  %v186_v62 = vmul.f32 %v1098_v40, %v1463_v19  ;;  %v412_v57 = vadd.f32 1e-08, %v296_v36  ;;  %vm320_vm4 = vcmp.eq.f32.partialorder %v1489_v49, inf }
  0xcc   :  { %1111 = vrsqrt.f32 %v1491_v50  ;;  %v284_v31 = vmul.f32 %v1100_v56, %v1457_v16  ;;  %v300_v32 = vsel %vm299_vm7, %v1461_v18, %v298_v59  ;;  %v316_v56 = vand.u32 2147483648, %v1474_v27 }
  0xcd   :  { %v1102_v60 = vpop.eup %1101  ;;  %v188_v11 = vsel %vm187_vm9, %v1463_v19, %v186_v62  ;;  %v303_v47 = vsel %vm301_vm8, %v302_v55, %v300_v32  ;;  %vm322_vm5 = vcmp.eq.f32.partialorder %v1489_v49, 0.0  ;;  %vm210_vm7 = vcmp.eq.f32.partialorder %v1491_v50, 0.0 }
  0xce   :  { %v1104_v3 = vpop.eup %1103  ;;  %v1513_v10 = vpop.xlane.xlu1 %151  ;;  %v305_v33 = vmul.f32 %v1102_v60, %v1468_v22  ;;  %v286_v59 = vsel %vm285_vm6, %v1457_v16, %v284_v31  ;;  %v191_v60 = vsel %vm189_vm10, %v190_v63, %v188_v11  ;;  %v413_v4 = vadd.f32 1e-08, %v303_v47 }
  0xcf   :  { %v1515_v20 = vpop.xlane.xlu0 %119  ;;  %1113 = vrsqrt.f32 %v1513_v10  ;;  %v193_v39 = vmul.f32 %v1104_v3, %v1470_v23  ;;  %v395_v3 = vadd.f32 1e-08, %v177_v25  ;;  %v204_v63 = vand.u32 2147483648, %v1476_v28 }
  0xd0   :  { %1115 = vrcp.f32 %v396_v61  ;;  %v307_v61 = vsel %vm306_vm11, %v1468_v22, %v305_v33  ;;  %vm208_vm6 = vcmp.eq.f32.partialorder %v1491_v50, inf  ;;  %vm327_vm8 = vcmp.eq.f32.partialorder %v1513_v10, inf }
  0xd1   :  { %v1106_v35 = vpop.eup %1105  ;;  %1117 = vrsqrt.f32 %v1515_v20  ;;  %v195_v55 = vsel %vm194_vm13, %v1470_v23, %v193_v39  ;;  %v310_v25 = vsel %vm308_vm12, %v309_v7, %v307_v61  ;;  %v323_v39 = vand.u32 2147483648, %v1489_v49 }
  0xd2   :  { %v312_v40 = vmul.f32 %v1106_v35, %v1474_v27  ;;  %v1538_v41 = vpop.xlane.xlu1 %153  ;;  %v1108_v15 = vpop.eup %1107  ;;  %v397_v35 = vadd.f32 1e-08, %v191_v60  ;;  %v198_v36 = vsel %vm196_vm14, %v197_v24, %v195_v55  ;;  %v414_v47 = vadd.f32 1e-08, %v310_v25 }
  0xd3   :  { %v1540_v42 = vpop.xlane.xlu0 %121  ;;  %1119 = vrsqrt.f32 %v1538_v41  ;;  %v200_v62 = vmul.f32 %v1108_v15, %v1476_v28  ;;  %vm329_vm9 = vcmp.eq.f32.partialorder %v1513_v10, 0.0  ;;  %vm215_vm10 = vcmp.eq.f32.partialorder %v1515_v20, inf }
  0xd4   :  { %v314_v19 = vsel %vm313_vm15, %v1474_v27, %v312_v40  ;;  %1121 = vrsqrt.f32 %v1540_v42  ;;  %v289_v25 = vsel %vm287_vm3, %v288_v48, %v286_v59  ;;  %vm217_vm11 = vcmp.eq.f32.partialorder %v1515_v20, 0.0 }
  0xd5   :  { %v1110_v18 = vpop.eup %1109  ;;  %1123 = vrcp.f32 %v412_v57  ;;  %v317_v40 = vsel %vm315_vm0, %v316_v56, %v314_v19  ;;  %v202_v22 = vsel %vm201_vm1, %v1476_v28, %v200_v62  ;;  %v398_v56 = vadd.f32 1e-08, %v198_v36 }
  0xd6   :  { %v1566_v31 = vpop.xlane.xlu1 %155  ;;  %v1112_v33 = vpop.eup %1111  ;;  %v319_v11 = vmul.f32 %v1110_v18, %v1489_v49  ;;  %1125 = vrcp.f32 %v395_v3  ;;  %v211_v57 = vand.u32 2147483648, %v1491_v50  ;;  %v415_v61 = vadd.f32 1e-08, %v317_v40 }
  0xd7   :  { %v1568_v32 = vpop.xlane.xlu0 %123  ;;  %v207_v7 = vmul.f32 %v1112_v33, %v1491_v50  ;;  %1127 = vrcp.f32 %v413_v4  ;;  %v205_v18 = vsel %vm203_vm2, %v204_v63, %v202_v22  ;;  %v330_v28 = vand.u32 2147483648, %v1513_v10 }
  0xd8   :  { %1129 = vrcp.f32 %v397_v35  ;;  %v321_v55 = vsel %vm320_vm4, %v1489_v49, %v319_v11  ;;  %v399_v33 = vadd.f32 1e-08, %v205_v18  ;;  %vm334_vm12 = vcmp.eq.f32.partialorder %v1538_v41, inf }
  0xd9   :  { %v1114_v15 = vpop.eup %1113  ;;  %1131 = vrsqrt.f32 %v1566_v31  ;;  %v209_v3 = vsel %vm208_vm6, %v1491_v50, %v207_v7  ;;  %v324_v35 = vsel %vm322_vm5, %v323_v39, %v321_v55  ;;  %v218_v39 = vand.u32 2147483648, %v1515_v20 }
  0xda   :  { %v1586_v23 = vpop.xlane.xlu1 %157  ;;  %v1116_v27 = vpop.eup %1115  ;;  %v326_v4 = vmul.f32 %v1114_v15, %v1513_v10  ;;  %1133 = vrsqrt.f32 %v1568_v32  ;;  %v212_v40 = vsel %vm210_vm7, %v211_v57, %v209_v3  ;;  %v411_v15 = vadd.f32 1e-08, %v289_v25 }
  0xdb   :  { %v1588_v24 = vpop.xlane.xlu0 %125  ;;  %v1118_v60 = vpop.eup %1117  ;;  %1135 = vrcp.f32 %v414_v47  ;;  %v416_v59 = vadd.f32 1e-08, %v324_v35  ;;  %v400_v47 = vadd.f32 1e-08, %v212_v40  ;;  %vm222_vm13 = vcmp.eq.f32.partialorder %v1540_v42, inf }
  0xdc   :  { %v214_v19 = vmul.f32 %v1118_v60, %v1515_v20  ;;  %1137 = vrcp.f32 %v398_v56  ;;  %v328_v49 = vsel %vm327_vm8, %v1513_v10, %v326_v4  ;;  %vm336_vm14 = vcmp.eq.f32.partialorder %v1538_v41, 0.0 }
  0xdd   :  { %v1120_v62 = vpop.eup %1119  ;;  %1139 = vrcp.f32 %v415_v61  ;;  %v331_v60 = vsel %vm329_vm9, %v330_v28, %v328_v49  ;;  %v460_v28 = vmul.f32 %v1116_v27, %v1345_v0  ;;  %vm224_vm15 = vcmp.eq.f32.partialorder %v1540_v42, 0.0 }
  0xde   :  { %v1605_v63 = vpop.xlane.xlu1 %159  ;;  %v1122_v11 = vpop.eup %1121  ;;  %v216_v22 = vsel %vm215_vm10, %v1515_v20, %v214_v19  ;;  %v333_v7 = vmul.f32 %v1120_v62, %v1538_v41  ;;  %1141 = vrcp.f32 %v411_v15  ;;  %v337_v62 = vand.u32 2147483648, %v1538_v41 }
  0xdf   :  { %v1613_v36 = vpop.xlane.xlu0 %127  ;;  %v221_v16 = vmul.f32 %v1122_v11, %v1540_v42  ;;  %v1624_v48 = vpop.eup %1123  ;;  %1143 = vrcp.f32 %v399_v33  ;;  %v219_v56 = vsel %vm217_vm11, %v218_v39, %v216_v22  ;;  %v417_v35 = vadd.f32 1e-08, %v331_v60 }
  0xe0   :  { %v1126_v50 = vpop.eup %1125  ;;  %v335_v61 = vsel %vm334_vm12, %v1538_v41, %v333_v7  ;;  %1145 = vrsqrt.f32 %v1586_v23  ;;  %v401_v19 = vadd.f32 1e-08, %v219_v56  ;;  %vm341_vm0 = vcmp.eq.f32.partialorder %v1566_v31, inf }
  0xe1   :  { %v1629_v57 = vpop.eup %1127  ;;  %v459_v18 = vmul.f32 %v1126_v50, %v1347_v1  ;;  %v223_v3 = vsel %vm222_vm13, %v1540_v42, %v221_v16  ;;  %1147 = vrsqrt.f32 %v1588_v24  ;;  %v225_v1 = vand.u32 2147483648, %v1540_v42 }
  0xe2   :  { %v1636_v20 = vpop.xlane.xlu1 %161  ;;  %v1130_v55 = vpop.eup %1129  ;;  %1149 = vrcp.f32 %v416_v59  ;;  %v338_v25 = vsel %vm336_vm14, %v337_v62, %v335_v61  ;;  %vm229_vm1 = vcmp.eq.f32.partialorder %v1568_v32, inf  ;;  %vm343_vm2 = vcmp.eq.f32.partialorder %v1566_v31, 0.0 }
  0xe3   :  { %v1642_v4 = vpop.xlane.xlu0 %129  ;;  %v1132_v10 = vpop.eup %1131  ;;  %970 = vmatprep.mubr.f32.mxu0 %v459_v18  ;;  %1151 = vrcp.f32 %v400_v47  ;;  %v226_v11 = vsel %vm224_vm15, %v225_v1, %v223_v3  ;;  %v461_v22 = vmul.f32 %v1130_v55, %v1363_v9  ;;  %v418_v0 = vadd.f32 1e-08, %v338_v25 }
  0xe4   :  { %v1134_v33 = vpop.eup %1133  ;;  %971 = vmatmul.mubr.f32.vlgmr.msra.gmra.mrb[0].mxu0 %v459_v18  ;;  %1153 = vrsqrt.f32 %v1613_v36  ;;  %v340_v42 = vmul.f32 %v1132_v10, %v1566_v31  ;;  %v402_v49 = vadd.f32 1e-08, %v226_v11  ;;  %v344_v59 = vand.u32 2147483648, %v1566_v31 }
  0xe5   :  { %v1647_v41 = vpop.eup %1135  ;;  %v228_v40 = vmul.f32 %v1134_v33, %v1568_v32  ;;  %972 = vmatprep.mubr.f32.mxu0 %v460_v28  ;;  %1155 = vrsqrt.f32 %v1605_v63  ;;  %v232_v50 = vand.u32 2147483648, %v1568_v32  ;;  %vm231_vm3 = vcmp.eq.f32.partialorder %v1568_v32, 0.0 }
  0xe6   :  { %v1138_v7 = vpop.eup %1137  ;;  %1157 = vrcp.f32 %v401_v19  ;;  %v1656_v27 = vpop.xlane.xlu1 %163  ;;  %vm348_vm4 = vcmp.eq.f32.partialorder %v1586_v23, inf  ;;  %v342_v18 = vsel %vm341_vm0, %v1566_v31, %v340_v42  ;;  %v351_v62 = vand.u32 2147483648, %v1586_v23 }
  0xe7   :  { %v1658_v15 = vpop.eup %1139  ;;  %v230_v9 = vsel %vm229_vm1, %v1568_v32, %v228_v40  ;;  %1159 = vrsqrt.f32 %v1642_v4  ;;  %v1663_v39 = vpop.xlane.xlu0 %131  ;;  %v462_v47 = vmul.f32 %v1138_v7, %v1371_v13  ;;  %vm350_vm5 = vcmp.eq.f32.partialorder %v1586_v23, 0.0 }
  0xe8   :  { %973 = vmatmul.mubr.f32.gmra.mrb[2].mxu0 %v460_v28  ;;  %v1142_v16 = vpop.eup %1141  ;;  %1161 = vrcp.f32 %v417_v35  ;;  %v233_v55 = vsel %vm231_vm3, %v232_v50, %v230_v9  ;;  %vm236_vm6 = vcmp.eq.f32.partialorder %v1588_v24, inf  ;;  %vm238_vm7 = vcmp.eq.f32.partialorder %v1588_v24, 0.0 }
  0xe9   :  { %974 = vmatprep.mubr.f32.mxu0 %v461_v22  ;;  %v1144_v56 = vpop.eup %1143  ;;  %v475_v60 = vmul.f32 %v1142_v16, %v1355_v5  ;;  %1163 = vrsqrt.f32 %v1636_v20  ;;  %v476_v5 = vmul.f32 %v1624_v48, %v1349_v2  ;;  %v239_v10 = vand.u32 2147483648, %v1588_v24 }
  0xea   :  { %v1146_v61 = vpop.eup %1145  ;;  %1165 = vrcp.f32 %v418_v0  ;;  %v463_v19 = vmul.f32 %v1144_v56, %v1379_v21  ;;  %v1687_v1 = vpop.xlane.xlu1 %165  ;;  %v345_v33 = vsel %vm343_vm2, %v344_v59, %v342_v18  ;;  %v403_v2 = vadd.f32 1e-08, %v233_v55 }
  0xeb   :  { %v1148_v3 = vpop.eup %1147  ;;  %1167 = vrcp.f32 %v402_v49  ;;  %1002 = vmatprep.mubr.f32.mxu1 %v475_v60  ;;  %v347_v48 = vmul.f32 %v1146_v61, %v1586_v23  ;;  %vm355_vm8 = vcmp.eq.f32.partialorder %v1605_v63, inf  ;;  %v1694_v35 = vpop.xlane.xlu0 %133  ;;  %v358_v11 = vand.u32 2147483648, %v1605_v63 }
  0xec   :  { %975 = vmatmul.mubr.f32.gmra.mrb[4].mxu0 %v461_v22  ;;  %v1681_v13 = vpop.eup %1149  ;;  %1003 = vmatmul.mubr.f32.vlgmr.msra.gmra.mrb[0].mxu1 %v475_v60  ;;  %v235_v32 = vmul.f32 %v1148_v3, %v1588_v24  ;;  %1169 = vrsqrt.f32 %v1656_v27  ;;  %vm243_vm9 = vcmp.eq.f32.partialorder %v1613_v36, inf  ;;  %vm245_vm10 = vcmp.eq.f32.partialorder %v1613_v36, 0.0 }
  0xed   :  { %976 = vmatprep.mubr.f32.mxu0 %v462_v47  ;;  %v1152_v28 = vpop.eup %1151  ;;  %1004 = vmatprep.mubr.f32.mxu1 %v476_v5  ;;  %1171 = vrsqrt.f32 %v1663_v39  ;;  %v246_v7 = vand.u32 2147483648, %v1613_v36  ;;  %v477_v0 = vmul.f32 %v1629_v57, %v1361_v8  ;;  %v419_v49 = vadd.f32 1e-08, %v345_v33 }
  0xee   :  { %v1154_v25 = vpop.eup %1153  ;;  %v237_v21 = vsel %vm236_vm6, %v1588_v24, %v235_v32  ;;  %vm357_vm11 = vcmp.eq.f32.partialorder %v1605_v63, 0.0  ;;  %v464_v16 = vmul.f32 %v1152_v28, %v1387_v30  ;;  %1173 = vrsqrt.f32 %v1694_v35  ;;  %v1725_v56 = vpop.xlane.xlu1 %167 }
  0xef   :  { %v1156_v31 = vpop.eup %1155  ;;  %v240_v40 = vsel %vm238_vm7, %v239_v10, %v237_v21  ;;  %v242_v22 = vmul.f32 %v1154_v25, %v1613_v36  ;;  %1175 = vrcp.f32 %v403_v2  ;;  %v349_v59 = vsel %vm348_vm4, %v1586_v23, %v347_v48  ;;  %v1741_v10 = vpop.xlane.xlu0 %135 }
  0xf0   :  { %977 = vmatmul.mubr.f32.gmra.mrb[6].mxu0 %v462_v47  ;;  %v1158_v42 = vpop.eup %1157  ;;  %v404_v9 = vadd.f32 1e-08, %v240_v40  ;;  %1005 = vmatmul.mubr.f32.gmra.mrb[2].mxu1 %v476_v5  ;;  %vm250_vm12 = vcmp.eq.f32.partialorder %v1642_v4, inf  ;;  %v354_v50 = vmul.f32 %v1156_v31, %v1605_v63  ;;  %1177 = vrsqrt.f32 %v1687_v1 }
  0xf1   :  { %978 = vmatprep.mubr.f32.mxu0 %v463_v19  ;;  %v1160_v24 = vpop.eup %1159  ;;  %v244_v8 = vsel %vm243_vm9, %v1613_v36, %v242_v22  ;;  %1006 = vmatprep.mubr.f32.mxu1 %v477_v0  ;;  %v253_v18 = vand.u32 2147483648, %v1642_v4  ;;  %v478_v55 = vmul.f32 %v1647_v41, %v1369_v12  ;;  %v352_v36 = vsel %vm350_vm5, %v351_v62, %v349_v59 }
  0xf2   :  { %v1718_v57 = vpop.eup %1161  ;;  %v247_v30 = vsel %vm245_vm10, %v246_v7, %v244_v8  ;;  %v249_v47 = vmul.f32 %v1160_v24, %v1642_v4  ;;  %1179 = vrcp.f32 %v404_v9  ;;  %vm252_vm13 = vcmp.eq.f32.partialorder %v1642_v4, 0.0  ;;  %v1757_v25 = vpop.xlane.xlu1 %169 }
  0xf3   :  { %v1164_v60 = vpop.eup %1163  ;;  %v405_v61 = vadd.f32 1e-08, %v247_v30  ;;  %v465_v32 = vmul.f32 %v1158_v42, %v1395_v38  ;;  %1181 = vrcp.f32 %v419_v49  ;;  %vm362_vm14 = vcmp.eq.f32.partialorder %v1636_v20, inf }
  0xf4   :  { %979 = vmatmul.mubr.f32.gmra.mrb[8].mxu0 %v463_v19  ;;  %v1730_v3 = vpop.eup %1165  ;;  %1007 = vmatmul.mubr.f32.gmra.mrb[4].mxu1 %v477_v0  ;;  %v251_v5 = vsel %vm250_vm12, %v1642_v4, %v249_v47  ;;  %vm364_vm15 = vcmp.eq.f32.partialorder %v1636_v20, 0.0  ;;  %v356_v62 = vsel %vm355_vm8, %v1605_v63, %v354_v50  ;;  %v361_v4 = vmul.f32 %v1164_v60, %v1636_v20  ;;  %v1771_v0 = vpop.xlane.xlu0 %137 }
  0xf5   :  { %980 = vmatprep.mubr.f32.mxu0 %v464_v16  ;;  %v1168_v12 = vpop.eup %1167  ;;  %v254_v23 = vsel %vm252_vm13, %v253_v18, %v251_v5  ;;  %1008 = vmatprep.mubr.f32.mxu1 %v478_v55  ;;  %1183 = vrcp.f32 %v405_v61  ;;  %v420_v28 = vadd.f32 1e-08, %v352_v36  ;;  %v365_v33 = vand.u32 2147483648, %v1636_v20 }
  0xf6   :  { %v1170_v41 = vpop.eup %1169  ;;  %v406_v19 = vadd.f32 1e-08, %v254_v23  ;;  %v479_v2 = vmul.f32 %v1658_v15, %v1373_v14  ;;  %1185 = vrsqrt.f32 %v1725_v56  ;;  %vm369_vm0 = vcmp.eq.f32.partialorder %v1656_v27, inf }
  0xf7   :  { %v1172_v38 = vpop.eup %1171  ;;  %vm257_vm1 = vcmp.eq.f32.partialorder %v1663_v39, inf  ;;  %vm259_vm2 = vcmp.eq.f32.partialorder %v1663_v39, 0.0  ;;  %v359_v14 = vsel %vm357_vm11, %v358_v11, %v356_v62  ;;  %v260_v15 = vand.u32 2147483648, %v1663_v39 }
  0xf8   :  { %981 = vmatmul.mubr.f32.gmra.mrb[10].mxu0 %v464_v16  ;;  %1009 = vmatmul.mubr.f32.gmra.mrb[6].mxu1 %v478_v55  ;;  %v256_v48 = vmul.f32 %v1172_v38, %v1663_v39  ;;  %1187 = vrsqrt.f32 %v1741_v10  ;;  %v466_v21 = vmul.f32 %v1168_v12, %v1403_v44  ;;  %v1174_v31 = vpop.eup %1173  ;;  %v363_v40 = vsel %vm362_vm14, %v1636_v20, %v361_v4 }
  0xf9   :  { %982 = vmatprep.mubr.f32.mxu0 %v465_v32  ;;  %1010 = vmatprep.mubr.f32.mxu1 %v479_v2  ;;  %1189 = vrcp.f32 %v406_v19  ;;  %v368_v22 = vmul.f32 %v1170_v41, %v1656_v27  ;;  %v1176_v63 = vpop.eup %1175  ;;  %v263_v42 = vmul.f32 %v1174_v31, %v1694_v35  ;;  %v480_v49 = vmul.f32 %v1681_v13, %v1385_v29 }
  0xfa   :  { %v258_v7 = vsel %vm257_vm1, %v1663_v39, %v256_v48  ;;  %1191 = vrsqrt.f32 %v1757_v25  ;;  %v1178_v44 = vpop.eup %1177  ;;  %vm264_vm3 = vcmp.eq.f32.partialorder %v1694_v35, inf  ;;  %v267_v39 = vand.u32 2147483648, %v1694_v35 }
  0xfb   :  { %v261_v11 = vsel %vm259_vm2, %v260_v15, %v258_v7  ;;  %1193 = vrcp.f32 %v420_v28  ;;  %v421_v24 = vadd.f32 1e-08, %v359_v14  ;;  %v265_v59 = vsel %vm264_vm3, %v1694_v35, %v263_v42 }
  0xfc   :  { %983 = vmatmul.mubr.f32.gmra.mrb[12].mxu0 %v465_v32  ;;  %v407_v9 = vadd.f32 1e-08, %v261_v11  ;;  %1011 = vmatmul.mubr.f32.gmra.mrb[8].mxu1 %v479_v2  ;;  %v1180_v16 = vpop.eup %1179  ;;  %vm266_vm4 = vcmp.eq.f32.partialorder %v1694_v35, 0.0  ;;  %1195 = vrsqrt.f32 %v1771_v0  ;;  %v366_v29 = vsel %vm364_vm15, %v365_v33, %v363_v40 }
  0xfd   :  { %984 = vmatprep.mubr.f32.mxu0 %v466_v21  ;;  %1012 = vmatprep.mubr.f32.mxu1 %v480_v49  ;;  %v370_v13 = vsel %vm369_vm0, %v1656_v27, %v368_v22  ;;  %v268_v8 = vsel %vm266_vm4, %v267_v39, %v265_v59  ;;  %v481_v50 = vmul.f32 %v1718_v57, %v1393_v37  ;;  %v1182_v30 = vpop.eup %1181  ;;  %v372_v20 = vand.u32 2147483648, %v1656_v27  ;;  %v1217_v22 = vld [vmem:[#allocation2 + $0xc8] sm:$0xff]  ;;  %v1218_v39 = vld [vmem:[#allocation2 + $0xd0] sm:$0xff] }
  0xfe   :  { %1197 = vrcp.f32 %v407_v9  ;;  %v375_v47 = vmul.f32 %v1178_v44, %v1687_v1  ;;  %v408_v60 = vadd.f32 1e-08, %v268_v8  ;;  %v467_v35 = vmul.f32 %v1176_v63, %v1411_v52 }
  0xff   :  { %v1184_v61 = vpop.eup %1183  ;;  %v468_v18 = vmul.f32 %v1180_v16, %v1417_v58  ;;  %vm371_vm5 = vcmp.eq.f32.partialorder %v1656_v27, 0.0  ;;  %1199 = vrcp.f32 %v421_v24  ;;  %v422_v37 = vadd.f32 1e-08, %v366_v29 }
 0x100   :  { %985 = vmatmul.mubr.f32.gmra.mrb[14].mxu0 %v466_v21  ;;  %1013 = vmatmul.mubr.f32.gmra.mrb[10].mxu1 %v480_v49  ;;  %v1186_v55 = vpop.eup %1185  ;;  %v373_v57 = vsel %vm371_vm5, %v372_v20, %v370_v13  ;;  %vm376_vm6 = vcmp.eq.f32.partialorder %v1687_v1, inf  ;;  %vm378_vm7 = vcmp.eq.f32.partialorder %v1687_v1, 0.0  ;;  %1201 = vrcp.f32 %v408_v60  ;;  %v1219_v13 = vld [vmem:[#allocation2 + $0xd8] sm:$0xff] }
 0x101   :  { %1014 = vmatprep.mubr.f32.mxu1 %v481_v50  ;;  %986 = vmatprep.mubr.f32.mxu0 %v467_v35  ;;  %v377_v5 = vsel %vm376_vm6, %v1687_v1, %v375_v47  ;;  %v482_v52 = vmul.f32 %v1730_v3, %v1401_v43  ;;  %v379_v27 = vand.u32 2147483648, %v1687_v1  ;;  %v382_v32 = vmul.f32 %v1186_v55, %v1725_v56  ;;  %v1220_v47 = vld [vmem:[#allocation2 + $0xe0] sm:$0xff] }
 0x102   :  { %v1188_v36 = vpop.eup %1187  ;;  %v469_v23 = vmul.f32 %v1184_v61, %v1421_v6  ;;  %v423_v62 = vadd.f32 1e-08, %v373_v57  ;;  %vm383_vm8 = vcmp.eq.f32.partialorder %v1725_v56, inf  ;;  %vm271_vm9 = vcmp.eq.f32.partialorder %v1741_v10, inf  ;;  %v1221_v61 = vld [vmem:[#allocation2 + $0xe8] sm:$0xff] }
 0x103   :  { %v1190_v58 = vpop.eup %1189  ;;  %v270_v12 = vmul.f32 %v1188_v36, %v1741_v10  ;;  %v274_v43 = vand.u32 2147483648, %v1741_v10  ;;  %1203 = vrcp.f32 %v422_v37  ;;  %v380_v4 = vsel %vm378_vm7, %v379_v27, %v377_v5  ;;  %v523_v5 = vld [vmem:[%s1916_s2] sm:$0x3]  ;;  %s1298_s2 = smov [#allocation7]  }
 0x104   :  { %987 = vmatmul.mubr.f32.gmra.mrb[16].mxu0 %v467_v35  ;;  %1015 = vmatmul.mubr.f32.gmra.mrb[12].mxu1 %v481_v50  ;;  %v1192_v41 = vpop.eup %1191  ;;  %vm273_vm10 = vcmp.eq.f32.partialorder %v1741_v10, 0.0  ;;  %v386_v6 = vand.u32 2147483648, %v1725_v56  ;;  %v483_v33 = vmul.f32 %v1182_v30, %v1409_v51  ;;  %v470_v2 = vmul.f32 %v1190_v58, %v1425_v17  ;;  %s925_s11 = sshll.u32 %s1298_s2, 4  ;;  %s926_s11 = int_to_ptr.vmem [resolvable:$true] %s925_s11 }
 0x105   :  { %988 = vmatprep.mubr.f32.mxu0 %v468_v18  ;;  %1016 = vmatprep.mubr.f32.mxu1 %v482_v52  ;;  %v1194_v3 = vpop.eup %1193  ;;  %v272_v19 = vsel %vm271_vm9, %v1741_v10, %v270_v12  ;;  %v384_v48 = vsel %vm383_vm8, %v1725_v56, %v382_v32  ;;  %v389_v15 = vmul.f32 %v1192_v41, %v1757_v25  ;;  %1205 = vrcp.f32 %v423_v62  ;;  %s1266_s12 = scalar_lea.vmem %s926_s11, 8192  ;;  %p1271_p3 = scmp.lt.s32.totalorder %s926_s11, %s926_s11 }
 0x106   :  { %v1196_v38 = vpop.eup %1195  ;;  %v275_v28 = vsel %vm273_vm10, %v274_v43, %v272_v19  ;;  %v424_v10 = vadd.f32 1e-08, %v380_v4  ;;  %vm278_vm11 = vcmp.eq.f32.partialorder %v1771_v0, inf  ;;  %v281_v31 = vand.u32 2147483648, %v1771_v0  ;;  %p1267_p2 = scmp.ne.s32.totalorder %s926_s11, %s1266_s12  ;;  %p1272_p4 = scmp.lt.s32.totalorder %s1266_s12, %s1266_s12 }
 0x107   :  { %v409_v14 = vadd.f32 1e-08, %v275_v28  ;;  %v277_v1 = vmul.f32 %v1196_v38, %v1771_v0  ;;  %vm385_vm12 = vcmp.eq.f32.partialorder %v1725_v56, 0.0  ;;  %vm280_vm13 = vcmp.eq.f32.partialorder %v1771_v0, 0.0 }
 0x108   :  { %989 = vmatmul.mubr.f32.gmra.mrb[18].mxu0 %v468_v18  ;;  %1017 = vmatmul.mubr.f32.gmra.mrb[14].mxu1 %v482_v52  ;;  %v1198_v21 = vpop.eup %1197  ;;  %v387_v17 = vsel %vm385_vm12, %v386_v6, %v384_v48  ;;  %vm390_vm14 = vcmp.eq.f32.partialorder %v1757_v25, inf  ;;  %v484_v7 = vmul.f32 %v1217_v22, %v1194_v3  ;;  %v393_v44 = vand.u32 2147483648, %v1757_v25  ;;  %p1273_p5 = por %p1272_p4, %p1271_p3 }
 0x109   :  { %990 = vmatprep.mubr.f32.mxu0 %v469_v23  ;;  %1018 = vmatprep.mubr.f32.mxu1 %v483_v33  ;;  %1207 = vrcp.f32 %v409_v14  ;;  %v279_v51 = vsel %vm278_vm11, %v1771_v0, %v277_v1  ;;  %v1200_v63 = vpop.eup %1199  ;;  %v391_v11 = vsel %vm390_vm14, %v1757_v25, %v389_v15  ;;  %v471_v56 = vmul.f32 %v1198_v21, %v1429_v26 }
 0x10a   :  { %v282_v40 = vsel %vm280_vm13, %v281_v31, %v279_v51  ;;  %v1202_v49 = vpop.eup %1201  ;;  %1209 = vrcp.f32 %v424_v10  ;;  %v425_v0 = vadd.f32 1e-08, %v387_v17  ;;  %vm392_vm15 = vcmp.eq.f32.partialorder %v1757_v25, 0.0  ;;  %p1274_p6 = pnand %p1273_p5, %p1267_p2 }
 0x10b   :  { %v410_v42 = vadd.f32 1e-08, %v282_v40  ;;  %v394_v9 = vsel %vm392_vm15, %v393_v44, %v391_v11  ;;  %v485_v16 = vmul.f32 %v1218_v39, %v1200_v63  ;;  %v472_v59 = vmul.f32 %v1202_v49, %v1433_v34 }
 0x10c   :  { %991 = vmatmul.mubr.f32.gmra.mrb[20].mxu0 %v469_v23  ;;  %1019 = vmatmul.mubr.f32.gmra.mrb[16].mxu1 %v483_v33  ;;  %v426_v26 = vadd.f32 1e-08, %v394_v9  ;;  %v525_v57 = vlaneseq }
 0x10d   :  { %992 = vmatprep.mubr.f32.mxu0 %v470_v2  ;;  %1020 = vmatprep.mubr.f32.mxu1 %v484_v7  ;;  %1211 = vrcp.f32 %v410_v42  ;;  %v1204_v24 = vpop.eup %1203 }
 0x10e   :  { %1213 = vrcp.f32 %v425_v0  ;;  %v486_v8 = vmul.f32 %v1219_v13, %v1204_v24 }
 0x10f   :  { %v1206_v29 = vpop.eup %1205  ;;  %1215 = vrcp.f32 %v426_v26 }
 0x110   :  { %993 = vmatmul.mubr.f32.gmra.mrb[22].mxu0 %v470_v2  ;;  %1021 = vmatmul.mubr.f32.gmra.mrb[18].mxu1 %v484_v7  ;;  %v487_v60 = vmul.f32 %v1220_v47, %v1206_v29 }
 0x111   :  { %994 = vmatprep.mubr.f32.mxu0 %v471_v56  ;;  %1022 = vmatprep.mubr.f32.mxu1 %v485_v16 }
 0x113   :  { %v1208_v50 = vpop.eup %1207 }
 0x114   :  { %995 = vmatmul.mubr.f32.gmra.mrb[24].mxu0 %v471_v56  ;;  %1023 = vmatmul.mubr.f32.gmra.mrb[20].mxu1 %v485_v16  ;;  %v473_v25 = vmul.f32 %v1208_v50, %v1439_v46  ;;  %v1210_v30 = vpop.eup %1209 }
 0x115   :  { %996 = vmatprep.mubr.f32.mxu0 %v472_v59  ;;  %1024 = vmatprep.mubr.f32.mxu1 %v486_v8  ;;  %v488_v20 = vmul.f32 %v1221_v61, %v1210_v30 }
 0x117   :  { %v1212_v35 = vpop.eup %1211 }
 0x118   :  { %997 = vmatmul.mubr.f32.gmra.mrb[26].mxu0 %v472_v59  ;;  %1025 = vmatmul.mubr.f32.gmra.mrb[22].mxu1 %v486_v8  ;;  %v474_v34 = vmul.f32 %v1212_v35, %v1447_v54  ;;  %v1214_v18 = vpop.eup %1213  ;;  %v526_v54 = vshrl.u32 %v525_v57, 7 }
 0x119   :  { %998 = vmatprep.mubr.f32.mxu0 %v473_v25  ;;  %1026 = vmatprep.mubr.f32.mxu1 %v487_v60  ;;  %v489_v46 = vmul.f32 %v1214_v18, %v1437_v45  ;;  %v1216_v55 = vpop.eup %1215 }
 0x11a   :  { %v490_v37 = vmul.f32 %v1216_v55, %v1445_v53  ;;  %v527_v36 = vsub.s32 0, %v526_v54  ;;  %v531_v52 = vsub.s32 1, %v526_v54 }
 0x11c   :  { %999 = vmatmul.mubr.f32.gmra.mrb[28].mxu0 %v473_v25  ;;  %1027 = vmatmul.mubr.f32.gmra.mrb[24].mxu1 %v487_v60  ;;  %v1834_v58 = vrot.slane %v523_v5, %v527_v36  ;;  %v1836_v45 = vrot.slane %v523_v5, %v531_v52 }
 0x11d   :  { %1000 = vmatprep.mubr.f32.mxu0 %v474_v34  ;;  %1028 = vmatprep.mubr.f32.mxu1 %v488_v20 }
 0x120   :  { %1001 = vmatmul.mubr.f32.gmra.mrb[30].mxu0 %v474_v34  ;;  %1029 = vmatmul.mubr.f32.gmra.mrb[26].mxu1 %v488_v20 }
 0x121   :  { %1030 = vmatprep.mubr.f32.mxu1 %v489_v46 }
 0x124   :  { %1031 = vmatmul.mubr.f32.gmra.mrb[28].mxu1 %v489_v46 }
 0x125   :  { %1032 = vmatprep.mubr.f32.mxu1 %v490_v37 }
 0x128   :  { %1033 = vmatmul.mubr.f32.gmra.mrb[30].mxu1 %v490_v37 }
 0x1b7   :  { %v601_v27 = vpop.f32.mrb[0].mxu0 }
 0x1b8   :  { %v602_v32 = vadd.f32 %v601_v27, %v1834_v58  ;;  %v603_v12 = vpop.f32.mrb[1].mxu0 }
 0x1b9   :  { %v604_v53 = vadd.f32 %v603_v12, %v1836_v45 }
 0x1ba   :  { %v792_v23 = vmax.f32 %v602_v32, 0.0 }
 0x1bb   :  { %v793_v41 = vmax.f32 %v604_v53, 0.0  ;;  %v607_v62 = vpop.f32.mrb[2].mxu0 }
 0x1bc   :  { %856 = vst [vmem:[#allocation7] sm:$0xff] %v792_v23  ;;  %v608_v43 = vadd.f32 %v607_v62, %v1834_v58  ;;  %v609_v3 = vpop.f32.mrb[3].mxu0 }
 0x1bd   :  { %857 = vst [vmem:[#allocation7 + $0x8] sm:$0xff] %v793_v41  ;;  %v610_v4 = vadd.f32 %v609_v3, %v1836_v45 }
 0x1be   :  { %v794_v19 = vmax.f32 %v608_v43, 0.0 }
 0x1bf   :  { %v795_v38 = vmax.f32 %v610_v4, 0.0  ;;  %v613_v6 = vpop.f32.mrb[4].mxu0  ;;  %v697_v28 = vpop.f32.mrb[0].mxu1 }
 0x1c0   :  { %858 = vst [vmem:[#allocation7 + $0x10] sm:$0xff] %v794_v19  ;;  %v614_v33 = vadd.f32 %v613_v6, %v1834_v58  ;;  %v615_v2 = vpop.f32.mrb[5].mxu0  ;;  %v698_v48 = vadd.f32 %v697_v28, %v1834_v58  ;;  %v699_v14 = vpop.f32.mrb[1].mxu1 }
 0x1c1   :  { %859 = vst [vmem:[#allocation7 + $0x18] sm:$0xff] %v795_v38  ;;  %v616_v15 = vadd.f32 %v615_v2, %v1836_v45  ;;  %v700_v1 = vadd.f32 %v699_v14, %v1836_v45 }
 0x1c2   :  { %v796_v21 = vmax.f32 %v614_v33, 0.0  ;;  %v824_v10 = vmax.f32 %v698_v48, 0.0 }
 0x1c3   :  { %v797_v31 = vmax.f32 %v616_v15, 0.0  ;;  %v619_v51 = vpop.f32.mrb[6].mxu0  ;;  %v825_v17 = vmax.f32 %v700_v1, 0.0  ;;  %v703_v40 = vpop.f32.mrb[2].mxu1 }
 0x1c4   :  { %860 = vst [vmem:[#allocation7 + $0x20] sm:$0xff] %v796_v21  ;;  %v620_v22 = vadd.f32 %v619_v51, %v1834_v58  ;;  %v621_v7 = vpop.f32.mrb[7].mxu0  ;;  %888 = vst [vmem:[#allocation7 + $0x100] sm:$0xff] %v824_v10  ;;  %v704_v63 = vadd.f32 %v703_v40, %v1834_v58  ;;  %v705_v11 = vpop.f32.mrb[3].mxu1 }
 0x1c5   :  { %861 = vst [vmem:[#allocation7 + $0x28] sm:$0xff] %v797_v31  ;;  %v622_v42 = vadd.f32 %v621_v7, %v1836_v45  ;;  %889 = vst [vmem:[#allocation7 + $0x108] sm:$0xff] %v825_v17  ;;  %v706_v56 = vadd.f32 %v705_v11, %v1836_v45 }
 0x1c6   :  { %v798_v49 = vmax.f32 %v620_v22, 0.0  ;;  %v826_v44 = vmax.f32 %v704_v63, 0.0 }
 0x1c7   :  { %v799_v0 = vmax.f32 %v622_v42, 0.0  ;;  %v625_v9 = vpop.f32.mrb[8].mxu0  ;;  %v827_v39 = vmax.f32 %v706_v56, 0.0  ;;  %v709_v16 = vpop.f32.mrb[4].mxu1 }
 0x1c8   :  { %862 = vst [vmem:[#allocation7 + $0x30] sm:$0xff] %v798_v49  ;;  %v626_v24 = vadd.f32 %v625_v9, %v1834_v58  ;;  %v627_v59 = vpop.f32.mrb[9].mxu0  ;;  %890 = vst [vmem:[#allocation7 + $0x110] sm:$0xff] %v826_v44  ;;  %v710_v26 = vadd.f32 %v709_v16, %v1834_v58  ;;  %v711_v29 = vpop.f32.mrb[5].mxu1 }
 0x1c9   :  { %863 = vst [vmem:[#allocation7 + $0x38] sm:$0xff] %v799_v0  ;;  %v628_v13 = vadd.f32 %v627_v59, %v1836_v45  ;;  %891 = vst [vmem:[#allocation7 + $0x118] sm:$0xff] %v827_v39  ;;  %v712_v8 = vadd.f32 %v711_v29, %v1836_v45 }
 0x1ca   :  { %v800_v50 = vmax.f32 %v626_v24, 0.0  ;;  %v828_v25 = vmax.f32 %v710_v26, 0.0 }
 0x1cb   :  { %v801_v30 = vmax.f32 %v628_v13, 0.0  ;;  %v631_v47 = vpop.f32.mrb[10].mxu0  ;;  %v829_v60 = vmax.f32 %v712_v8, 0.0  ;;  %v715_v35 = vpop.f32.mrb[6].mxu1 }
 0x1cc   :  { %864 = vst [vmem:[#allocation7 + $0x40] sm:$0xff] %v800_v50  ;;  %v632_v34 = vadd.f32 %v631_v47, %v1834_v58  ;;  %v633_v61 = vpop.f32.mrb[11].mxu0  ;;  %892 = vst [vmem:[#allocation7 + $0x120] sm:$0xff] %v828_v25  ;;  %v716_v20 = vadd.f32 %v715_v35, %v1834_v58  ;;  %v717_v18 = vpop.f32.mrb[7].mxu1 }
 0x1cd   :  { %865 = vst [vmem:[#allocation7 + $0x48] sm:$0xff] %v801_v30  ;;  %v634_v46 = vadd.f32 %v633_v61, %v1836_v45  ;;  %893 = vst [vmem:[#allocation7 + $0x128] sm:$0xff] %v829_v60  ;;  %v718_v55 = vadd.f32 %v717_v18, %v1836_v45 }
 0x1ce   :  { %v802_v37 = vmax.f32 %v632_v34, 0.0  ;;  %v830_v57 = vmax.f32 %v716_v20, 0.0 }
 0x1cf   :  { %v803_v54 = vmax.f32 %v634_v46, 0.0  ;;  %v637_v36 = vpop.f32.mrb[12].mxu0  ;;  %v831_v5 = vmax.f32 %v718_v55, 0.0  ;;  %v721_v52 = vpop.f32.mrb[8].mxu1 }
 0x1d0   :  { %866 = vst [vmem:[#allocation7 + $0x50] sm:$0xff] %v802_v37  ;;  %v638_v27 = vadd.f32 %v637_v36, %v1834_v58  ;;  %v639_v32 = vpop.f32.mrb[13].mxu0  ;;  %894 = vst [vmem:[#allocation7 + $0x130] sm:$0xff] %v830_v57  ;;  %v722_v12 = vadd.f32 %v721_v52, %v1834_v58  ;;  %v723_v53 = vpop.f32.mrb[9].mxu1 }
 0x1d1   :  { %867 = vst [vmem:[#allocation7 + $0x58] sm:$0xff] %v803_v54  ;;  %v640_v23 = vadd.f32 %v639_v32, %v1836_v45  ;;  %895 = vst [vmem:[#allocation7 + $0x138] sm:$0xff] %v831_v5  ;;  %v724_v41 = vadd.f32 %v723_v53, %v1836_v45 }
 0x1d2   :  { %v804_v62 = vmax.f32 %v638_v27, 0.0  ;;  %v832_v43 = vmax.f32 %v722_v12, 0.0 }
 0x1d3   :  { %v805_v3 = vmax.f32 %v640_v23, 0.0  ;;  %v643_v4 = vpop.f32.mrb[14].mxu0  ;;  %v833_v19 = vmax.f32 %v724_v41, 0.0  ;;  %v727_v38 = vpop.f32.mrb[10].mxu1 }
 0x1d4   :  { %868 = vst [vmem:[#allocation7 + $0x60] sm:$0xff] %v804_v62  ;;  %v644_v6 = vadd.f32 %v643_v4, %v1834_v58  ;;  %v645_v28 = vpop.f32.mrb[15].mxu0  ;;  %896 = vst [vmem:[#allocation7 + $0x140] sm:$0xff] %v832_v43  ;;  %v728_v33 = vadd.f32 %v727_v38, %v1834_v58  ;;  %v729_v2 = vpop.f32.mrb[11].mxu1 }
 0x1d5   :  { %869 = vst [vmem:[#allocation7 + $0x68] sm:$0xff] %v805_v3  ;;  %v646_v48 = vadd.f32 %v645_v28, %v1836_v45  ;;  %897 = vst [vmem:[#allocation7 + $0x148] sm:$0xff] %v833_v19  ;;  %v730_v14 = vadd.f32 %v729_v2, %v1836_v45 }
 0x1d6   :  { %v806_v15 = vmax.f32 %v644_v6, 0.0  ;;  %v834_v1 = vmax.f32 %v728_v33, 0.0 }
 0x1d7   :  { %v807_v21 = vmax.f32 %v646_v48, 0.0  ;;  %v649_v10 = vpop.f32.mrb[16].mxu0  ;;  %v835_v31 = vmax.f32 %v730_v14, 0.0  ;;  %v733_v51 = vpop.f32.mrb[12].mxu1 }
 0x1d8   :  { %870 = vst [vmem:[#allocation7 + $0x70] sm:$0xff] %v806_v15  ;;  %v650_v17 = vadd.f32 %v649_v10, %v1834_v58  ;;  %v651_v40 = vpop.f32.mrb[17].mxu0  ;;  %898 = vst [vmem:[#allocation7 + $0x150] sm:$0xff] %v834_v1  ;;  %v734_v22 = vadd.f32 %v733_v51, %v1834_v58  ;;  %v735_v7 = vpop.f32.mrb[13].mxu1 }
 0x1d9   :  { %871 = vst [vmem:[#allocation7 + $0x78] sm:$0xff] %v807_v21  ;;  %v652_v63 = vadd.f32 %v651_v40, %v1836_v45  ;;  %899 = vst [vmem:[#allocation7 + $0x158] sm:$0xff] %v835_v31  ;;  %v736_v11 = vadd.f32 %v735_v7, %v1836_v45 }
 0x1da   :  { %v808_v42 = vmax.f32 %v650_v17, 0.0  ;;  %v836_v56 = vmax.f32 %v734_v22, 0.0 }
 0x1db   :  { %v809_v49 = vmax.f32 %v652_v63, 0.0  ;;  %v655_v44 = vpop.f32.mrb[18].mxu0  ;;  %v837_v0 = vmax.f32 %v736_v11, 0.0  ;;  %v739_v9 = vpop.f32.mrb[14].mxu1 }
 0x1dc   :  { %872 = vst [vmem:[#allocation7 + $0x80] sm:$0xff] %v808_v42  ;;  %v656_v39 = vadd.f32 %v655_v44, %v1834_v58  ;;  %v657_v16 = vpop.f32.mrb[19].mxu0  ;;  %900 = vst [vmem:[#allocation7 + $0x160] sm:$0xff] %v836_v56  ;;  %v740_v24 = vadd.f32 %v739_v9, %v1834_v58  ;;  %v741_v59 = vpop.f32.mrb[15].mxu1 }
 0x1dd   :  { %873 = vst [vmem:[#allocation7 + $0x88] sm:$0xff] %v809_v49  ;;  %v658_v26 = vadd.f32 %v657_v16, %v1836_v45  ;;  %901 = vst [vmem:[#allocation7 + $0x168] sm:$0xff] %v837_v0  ;;  %v742_v29 = vadd.f32 %v741_v59, %v1836_v45 }
 0x1de   :  { %v810_v13 = vmax.f32 %v656_v39, 0.0  ;;  %v838_v8 = vmax.f32 %v740_v24, 0.0 }
 0x1df   :  { %v811_v50 = vmax.f32 %v658_v26, 0.0  ;;  %v661_v25 = vpop.f32.mrb[20].mxu0  ;;  %v839_v30 = vmax.f32 %v742_v29, 0.0  ;;  %v745_v47 = vpop.f32.mrb[16].mxu1 }
 0x1e0   :  { %874 = vst [vmem:[#allocation7 + $0x90] sm:$0xff] %v810_v13  ;;  %v662_v60 = vadd.f32 %v661_v25, %v1834_v58  ;;  %v663_v35 = vpop.f32.mrb[21].mxu0  ;;  %902 = vst [vmem:[#allocation7 + $0x170] sm:$0xff] %v838_v8  ;;  %v746_v34 = vadd.f32 %v745_v47, %v1834_v58  ;;  %v747_v61 = vpop.f32.mrb[17].mxu1 }
 0x1e1   :  { %875 = vst [vmem:[#allocation7 + $0x98] sm:$0xff] %v811_v50  ;;  %v664_v20 = vadd.f32 %v663_v35, %v1836_v45  ;;  %903 = vst [vmem:[#allocation7 + $0x178] sm:$0xff] %v839_v30  ;;  %v748_v18 = vadd.f32 %v747_v61, %v1836_v45 }
 0x1e2   :  { %v812_v46 = vmax.f32 %v662_v60, 0.0  ;;  %v840_v55 = vmax.f32 %v746_v34, 0.0 }
 0x1e3   :  { %v813_v37 = vmax.f32 %v664_v20, 0.0  ;;  %v667_v57 = vpop.f32.mrb[22].mxu0  ;;  %v841_v54 = vmax.f32 %v748_v18, 0.0  ;;  %v751_v36 = vpop.f32.mrb[18].mxu1 }
 0x1e4   :  { %876 = vst [vmem:[#allocation7 + $0xa0] sm:$0xff] %v812_v46  ;;  %v668_v5 = vadd.f32 %v667_v57, %v1834_v58  ;;  %v669_v52 = vpop.f32.mrb[23].mxu0  ;;  %904 = vst [vmem:[#allocation7 + $0x180] sm:$0xff] %v840_v55  ;;  %v752_v27 = vadd.f32 %v751_v36, %v1834_v58  ;;  %v753_v32 = vpop.f32.mrb[19].mxu1 }
 0x1e5   :  { %877 = vst [vmem:[#allocation7 + $0xa8] sm:$0xff] %v813_v37  ;;  %v670_v12 = vadd.f32 %v669_v52, %v1836_v45  ;;  %905 = vst [vmem:[#allocation7 + $0x188] sm:$0xff] %v841_v54  ;;  %v754_v53 = vadd.f32 %v753_v32, %v1836_v45 }
 0x1e6   :  { %v814_v23 = vmax.f32 %v668_v5, 0.0  ;;  %v842_v41 = vmax.f32 %v752_v27, 0.0 }
 0x1e7   :  { %v815_v62 = vmax.f32 %v670_v12, 0.0  ;;  %v673_v43 = vpop.f32.mrb[24].mxu0  ;;  %v843_v3 = vmax.f32 %v754_v53, 0.0  ;;  %v757_v4 = vpop.f32.mrb[20].mxu1 }
 0x1e8   :  { %878 = vst [vmem:[#allocation7 + $0xb0] sm:$0xff] %v814_v23  ;;  %v674_v19 = vadd.f32 %v673_v43, %v1834_v58  ;;  %v675_v38 = vpop.f32.mrb[25].mxu0  ;;  %906 = vst [vmem:[#allocation7 + $0x190] sm:$0xff] %v842_v41  ;;  %v758_v6 = vadd.f32 %v757_v4, %v1834_v58  ;;  %v759_v28 = vpop.f32.mrb[21].mxu1 }
 0x1e9   :  { %879 = vst [vmem:[#allocation7 + $0xb8] sm:$0xff] %v815_v62  ;;  %v676_v33 = vadd.f32 %v675_v38, %v1836_v45  ;;  %907 = vst [vmem:[#allocation7 + $0x198] sm:$0xff] %v843_v3  ;;  %v760_v2 = vadd.f32 %v759_v28, %v1836_v45 }
 0x1ea   :  { %v816_v48 = vmax.f32 %v674_v19, 0.0  ;;  %v844_v14 = vmax.f32 %v758_v6, 0.0 }
 0x1eb   :  { %v817_v15 = vmax.f32 %v676_v33, 0.0  ;;  %v679_v1 = vpop.f32.mrb[26].mxu0  ;;  %v845_v21 = vmax.f32 %v760_v2, 0.0  ;;  %v763_v10 = vpop.f32.mrb[22].mxu1 }
 0x1ec   :  { %880 = vst [vmem:[#allocation7 + $0xc0] sm:$0xff] %v816_v48  ;;  %v680_v31 = vadd.f32 %v679_v1, %v1834_v58  ;;  %v681_v51 = vpop.f32.mrb[27].mxu0  ;;  %908 = vst [vmem:[#allocation7 + $0x1a0] sm:$0xff] %v844_v14  ;;  %v764_v17 = vadd.f32 %v763_v10, %v1834_v58  ;;  %v765_v40 = vpop.f32.mrb[23].mxu1 }
 0x1ed   :  { %881 = vst [vmem:[#allocation7 + $0xc8] sm:$0xff] %v817_v15  ;;  %v682_v22 = vadd.f32 %v681_v51, %v1836_v45  ;;  %909 = vst [vmem:[#allocation7 + $0x1a8] sm:$0xff] %v845_v21  ;;  %v766_v7 = vadd.f32 %v765_v40, %v1836_v45 }
 0x1ee   :  { %v818_v63 = vmax.f32 %v680_v31, 0.0  ;;  %v846_v11 = vmax.f32 %v764_v17, 0.0 }
 0x1ef   :  { %v819_v42 = vmax.f32 %v682_v22, 0.0  ;;  %v685_v56 = vpop.f32.mrb[28].mxu0  ;;  %v847_v49 = vmax.f32 %v766_v7, 0.0  ;;  %v769_v44 = vpop.f32.mrb[24].mxu1 }
 0x1f0   :  { %882 = vst [vmem:[#allocation7 + $0xd0] sm:$0xff] %v818_v63  ;;  %v686_v0 = vadd.f32 %v685_v56, %v1834_v58  ;;  %v687_v9 = vpop.f32.mrb[29].mxu0  ;;  %910 = vst [vmem:[#allocation7 + $0x1b0] sm:$0xff] %v846_v11  ;;  %v770_v39 = vadd.f32 %v769_v44, %v1834_v58  ;;  %v771_v16 = vpop.f32.mrb[25].mxu1 }
 0x1f1   :  { %883 = vst [vmem:[#allocation7 + $0xd8] sm:$0xff] %v819_v42  ;;  %v688_v24 = vadd.f32 %v687_v9, %v1836_v45  ;;  %911 = vst [vmem:[#allocation7 + $0x1b8] sm:$0xff] %v847_v49  ;;  %v772_v59 = vadd.f32 %v771_v16, %v1836_v45 }
 0x1f2   :  { %v820_v26 = vmax.f32 %v686_v0, 0.0  ;;  %v848_v29 = vmax.f32 %v770_v39, 0.0 }
 0x1f3   :  { %v821_v13 = vmax.f32 %v688_v24, 0.0  ;;  %v691_v8 = vpop.f32.mrb[30].mxu0  ;;  %v849_v50 = vmax.f32 %v772_v59, 0.0  ;;  %v775_v25 = vpop.f32.mrb[26].mxu1 }
 0x1f4   :  { %884 = vst [vmem:[#allocation7 + $0xe0] sm:$0xff] %v820_v26  ;;  %v692_v30 = vadd.f32 %v691_v8, %v1834_v58  ;;  %v693_v47 = vpop.f32.mrb[31].mxu0  ;;  %912 = vst [vmem:[#allocation7 + $0x1c0] sm:$0xff] %v848_v29  ;;  %v776_v60 = vadd.f32 %v775_v25, %v1834_v58  ;;  %v777_v35 = vpop.f32.mrb[27].mxu1 }
 0x1f5   :  { %885 = vst [vmem:[#allocation7 + $0xe8] sm:$0xff] %v821_v13  ;;  %v694_v34 = vadd.f32 %v693_v47, %v1836_v45  ;;  %913 = vst [vmem:[#allocation7 + $0x1c8] sm:$0xff] %v849_v50  ;;  %v778_v61 = vadd.f32 %v777_v35, %v1836_v45 }
 0x1f6   :  { %v822_v20 = vmax.f32 %v692_v30, 0.0  ;;  %v850_v18 = vmax.f32 %v776_v60, 0.0 }
 0x1f7   :  { %v823_v46 = vmax.f32 %v694_v34, 0.0  ;;  %v851_v55 = vmax.f32 %v778_v61, 0.0  ;;  %v781_v37 = vpop.f32.mrb[28].mxu1 }
 0x1f8   :  { %886 = vst [vmem:[#allocation7 + $0xf0] sm:$0xff] %v822_v20  ;;  %914 = vst [vmem:[#allocation7 + $0x1d0] sm:$0xff] %v850_v18  ;;  %v782_v57 = vadd.f32 %v781_v37, %v1834_v58  ;;  %v783_v54 = vpop.f32.mrb[29].mxu1 }
 0x1f9   :  { %887 = vst [vmem:[#allocation7 + $0xf8] sm:$0xff] %v823_v46  ;;  %915 = vst [vmem:[#allocation7 + $0x1d8] sm:$0xff] %v851_v55  ;;  %v784_v36 = vadd.f32 %v783_v54, %v1836_v45 }
 0x1fa   :  { %v852_v5 = vmax.f32 %v782_v57, 0.0 }
 0x1fb   :  { %v853_v52 = vmax.f32 %v784_v36, 0.0  ;;  %v787_v27 = vpop.f32.mrb[30].mxu1 }
 0x1fc   :  { %916 = vst [vmem:[#allocation7 + $0x1e0] sm:$0xff] %v852_v5  ;;  %v788_v32 = vadd.f32 %v787_v27, %v1834_v58  ;;  %v789_v12 = vpop.f32.mrb[31].mxu1 }
 0x1fd   :  { %917 = vst [vmem:[#allocation7 + $0x1e8] sm:$0xff] %v853_v52  ;;  %v790_v53 = vadd.f32 %v789_v12, %v1836_v45 }
 0x1fe   :  { %v854_v23 = vmax.f32 %v788_v32, 0.0 }
 0x1ff   :  { %v855_v41 = vmax.f32 %v790_v53, 0.0 }
 0x200   :  { %918 = vst [vmem:[#allocation7 + $0x1f0] sm:$0xff] %v854_v23 }
 0x201   :  { %919 = vst [vmem:[#allocation7 + $0x1f8] sm:$0xff] %v855_v41 }
 0x202   :  { %1277 = shalt.err (!%p1274_p6)
}
 0x203   :  { %s1278_s15 = scalar_lea.hbm %s1917_s3, 8192 }
 0x204   :  { %p1279_p7 = scmp.ne.s32.totalorder %s1917_s3, %s1278_s15  ;;  %p1282_p8 = scmp.lt.u32.totalorder %s1278_s15, %s1917_s3 }
 0x206   :  { %p1284_p9 = pnand %p1282_p8, %p1279_p7 }
 0x208   :  { %1287 = shalt.err (!%p1284_p9)
}
 0x209   :  { %s1299_s20 = smov 256   ;;  %s1300_s21 = smov 16  }
 0x20a   :  { %931 = dma.vmem_to_hbm [thread:$0]  %s926_s11, 8192, %s1917_s3, [#allocation4], %s1299_s20, %s1299_s20, %s1300_s21  }
 0x20b   :  { %1292 = dma.done.wait [#allocation4], 8192  }
 0x20c   :  { %1293 = vsyncadd [#allocation4], 4294959104 }
 0x20d   :  { %935 = vsyncpa [#allocation3], 1 }
 0x20e   :  { %936 = vsyncpa [#allocation6], 1 }
 0x20f   :  { %937 = vsyncpa [#allocation4], 1 }

</bundles_post_ra>
